<compile_context>
chip_gen: v6e
topology: v6e:2x2x1
jax: 0.10.0
libtpu: 0.0.40
codegen_flags: <defaults>
</compile_context>

<pallas_src>
import functools
import math

import numpy as np

import jax
import jax.numpy as jnp
from jax.experimental import pallas as pl
from jax.experimental.pallas import tpu as pltpu


# ----------------------------------------------------------------------------
# Trace-time constant builders (numpy; all shapes are static Python ints).
# ----------------------------------------------------------------------------
def _interp1d_matrix(n):
    """(2n, n) matrix implementing 2x bilinear upsampling, align_corners=False."""
    m = np.zeros((2 * n, n), np.float32)
    for o in range(2 * n):
        src = max((o + 0.5) / 2.0 - 0.5, 0.0)
        i0 = min(int(math.floor(src)), n - 1)
        i1 = min(i0 + 1, n - 1)
        w1 = src - i0
        m[o, i0] += 1.0 - w1
        m[o, i1] += w1
    return m


def _upsample2x_matrix(h, w, bblk):
    """(bblk*h*w, bblk*4*h*w) bf16: x_flat @ M == flat(2x bilinear upsample).

    Block-diagonal over the bblk images folded into the lane dimension.  All
    entries are products of {0.25, 0.75, 1.0} and are exact in bfloat16.
    """
    m = np.kron(_interp1d_matrix(h), _interp1d_matrix(w)).T        # (h*w, 4hw)
    m = np.kron(np.eye(bblk, dtype=np.float32), m)                 # block-diag
    return jnp.asarray(m, jnp.bfloat16)


def _tap_masks(bblk, h, w):
    """(9, bblk*h*w) f32 validity mask per 3x3 tap (row 4 == center == ones).

    Zeroes lanes whose tap would read outside its own image (reproduces the
    zero 'SAME' padding and stops rolls leaking across image boundaries).
    """
    hw = h * w
    p = np.arange(bblk * hw) % hw
    y, x = p // w, p % w
    rows = []
    for dy in range(3):
        for dx in range(3):
            m = np.ones(bblk * hw, np.float32)
            if dy == 0:
                m *= (y != 0)
            if dy == 2:
                m *= (y != h - 1)
            if dx == 0:
                m *= (x != 0)
            if dx == 2:
                m *= (x != w - 1)
            rows.append(m)
    return jnp.asarray(np.stack(rows, axis=0))


# ----------------------------------------------------------------------------
# Traceable weight/bias packers (channel-padded, tap-major column order).
# ----------------------------------------------------------------------------
def _pack_conv_weight(w_hwio, cin_pad, cout_pad):
    """HWIO (3,3,Cin,Cout) -> bf16 (cout_pad, 9*cin_pad); col = t*cin_pad + cin."""
    kh, kw, cin, cout = w_hwio.shape
    w = jnp.transpose(w_hwio, (3, 0, 1, 2))                  # (cout, 3, 3, cin)
    w = jnp.pad(w, ((0, cout_pad - cout), (0, 0), (0, 0), (0, cin_pad - cin)))
    return w.reshape(cout_pad, kh * kw * cin_pad).astype(jnp.bfloat16)


def _pack_bias(b, cout_pad):
    return jnp.pad(b, (0, cout_pad - b.shape[0])).reshape(-1, 1).astype(jnp.float32)


# ----------------------------------------------------------------------------
# Fused Pallas kernel: upsample -> conv1+ReLU -> (concat) -> conv2a+ReLU
#                      -> conv2b+ReLU.   One grid step = B_blk images.
# All activations are (Cpad, B_blk*H*W) lane-dense f32; MXU operands bf16.
# ----------------------------------------------------------------------------
def _up_fused_kernel(x1_ref, x2_ref, mup_ref, mask_ref,
                     w1_ref, b1_ref, w2a_x2_ref, w2a_y1_ref, b2a_ref,
                     w2b_ref, b2b_ref, o_ref, *, W):
    L = x2_ref.shape[1]                      # B_blk * H * W (lane extent)

    # Hoisted per-tap boundary masks (read once, reused by all 4 im2col calls).
    tap_masks = mask_ref[...]
    mask_rows = [tap_masks[t:t + 1, :] for t in range(9)]

    def im2col(x):
        """x: (Cp, L) f32, Cp % 8 == 0  ->  (9*Cp, L) bf16 patch matrix."""
        taps = []
        for dy in range(3):
            for dx in range(3):
                t = dy * 3 + dx
                shift = ((1 - dy) * W + (1 - dx)) % L        # static lane roll
                p = x if shift == 0 else pltpu.roll(x, shift, axis=1)
                if t != 4:                                   # center needs no mask
                    p = p * mask_rows[t]
                taps.append(p)                               # 8-aligned pieces
        return jnp.concatenate(taps, axis=0).astype(jnp.bfloat16)

    def bias_relu(y, b_ref):
        return jnp.maximum(y + b_ref[...], 0.0)

    # 2x bilinear upsample (align_corners=False): one bf16 MXU matmul against a
    # block-diagonal constant; output is already in the lane-flat image layout.
    u = jnp.dot(x1_ref[...].astype(jnp.bfloat16), mup_ref[...],
                preferred_element_type=jnp.float32)                  # (C1p, L)

    # one_conv: Conv3x3 + ReLU (padded output rows stay exactly zero).
    y1 = bias_relu(jnp.dot(w1_ref[...], im2col(u),
                           preferred_element_type=jnp.float32), b1_ref)

    # double_conv conv a on cat([x2, y1], channel): the channel concat is folded
    # into two weight halves accumulated on the same f32 accumulator.
    y2 = jnp.dot(w2a_x2_ref[...], im2col(x2_ref[...]),
                 preferred_element_type=jnp.float32)
    y2 = y2 + jnp.dot(w2a_y1_ref[...], im2col(y1),
                      preferred_element_type=jnp.float32)
    y2 = bias_relu(y2, b2a_ref)

    # double_conv conv b.
    y3 = bias_relu(jnp.dot(w2b_ref[...], im2col(y2),
                           preferred_element_type=jnp.float32), b2b_ref)

    o_ref[...] = y3                          # lane-dense (Cout_pad, L) store


# ----------------------------------------------------------------------------
# The `up` module forward (if_convt=False), fully fused.
# ----------------------------------------------------------------------------
def _ceil8(c):
    return ((c + 7) // 8) * 8


def _pick_bblk(n, h1w1, hw):
    """Images per grid step: prefer >=2 parallel steps with 128-aligned lanes."""
    def lane_ok(b):
        return (((b * h1w1) % 128 == 0) or b == n) and \
               (((b * hw) % 128 == 0) or b == n)
    if n % 2 == 0 and lane_ok(n // 2):
        return n // 2
    return n          # single step; blocks == full arrays (always legal)


def up_forward(x1_nchw, x2_nchw, params):
    N, C1, H1, W1 = x1_nchw.shape
    N2, C2, H2, W2 = x2_nchw.shape
    assert N == N2
    if (2 * H1, 2 * W1) != (H2, W2):
        # TODO(synk): general F.pad / crop of conv1(up(x1)) to x2's spatial size
        # is not fused; SSDCNet always feeds exact 2x-related feature maps here.
        raise NotImplementedError(
            "fused `up` kernel requires 2*x1 spatial == x2 spatial")
    HW, H1W1 = H2 * W2, H1 * W1

    C1out = params["w1"].shape[3]
    Ccat = params["w2a"].shape[2]
    Cout = params["w2a"].shape[3]
    assert Ccat == C2 + C1out, "cat_in_ch must equal x2_ch + up_out_ch"
    assert params["w2b"].shape[2] == Cout

    C1p, C2p = _ceil8(C1), _ceil8(C2)
    C1op, Coutp = _ceil8(C1out), _ceil8(Cout)

    B_blk = _pick_bblk(N, H1W1, HW)
    grid = (N // B_blk,)
    L1, L = B_blk * H1W1, B_blk * HW

    # Channel-major, channel-padded, lane-flat activations: (Cpad, N*H*W).
    # (Wrapper-side layout plumbing only; tiny tensors.)
    def to_flat(x, cpad):
        n, c, h, w = x.shape
        xf = jnp.transpose(x.reshape(n, c, h * w), (1, 0, 2))      # (C, N, HW)
        xf = jnp.pad(xf, ((0, cpad - c), (0, 0), (0, 0)))
        return xf.reshape(cpad, n * h * w).astype(jnp.float32)

    x1f = to_flat(x1_nchw, C1p)            # (C1p, N*H1W1)
    x2f = to_flat(x2_nchw, C2p)            # (C2p, N*HW)

    # Packed bf16 weights (tap-major, channel-padded columns) + f32 biases.
    w1p = _pack_conv_weight(params["w1"], C1p, C1op)
    b1p = _pack_bias(params["b1"], C1op)
    w2a_x2 = _pack_conv_weight(params["w2a"][:, :, :C2, :], C2p, Coutp)
    w2a_y1 = _pack_conv_weight(params["w2a"][:, :, C2:, :], C1op, Coutp)
    b2ap = _pack_bias(params["b2a"], Coutp)
    w2bp = _pack_conv_weight(params["w2b"], Coutp, Coutp)
    b2bp = _pack_bias(params["b2b"], Coutp)

    m_up = _upsample2x_matrix(H1, W1, B_blk)     # (L1, L) bf16 constant
    masks = _tap_masks(B_blk, H2, W2)            # (9, L) f32 constant

    def const_spec(shape):
        return pl.BlockSpec(shape, lambda g: (0, 0))

    out_flat = pl.pallas_call(
        functools.partial(_up_fused_kernel, W=W2),
        out_shape=jax.ShapeDtypeStruct((Coutp, N * HW), jnp.float32),
        grid_spec=pltpu.PrefetchScalarGridSpec(
            num_scalar_prefetch=0,
            grid=grid,
            in_specs=[
                pl.BlockSpec((C1p, L1), lambda g: (0, g)),   # x1 slab
                pl.BlockSpec((C2p, L), lambda g: (0, g)),    # x2 slab
                const_spec((L1, L)),                         # upsample matrix
                const_spec((9, L)),                          # per-tap masks
                const_spec((C1op, 9 * C1p)),                 # w1
                const_spec((C1op, 1)),                       # b1
                const_spec((Coutp, 9 * C2p)),                # w2a (x2 half)
                const_spec((Coutp, 9 * C1op)),               # w2a (y1 half)
                const_spec((Coutp, 1)),                      # b2a
                const_spec((Coutp, 9 * Coutp)),              # w2b
                const_spec((Coutp, 1)),                      # b2b
            ],
            out_specs=pl.BlockSpec((Coutp, L), lambda g: (0, g)),
        ),
        compiler_params=pltpu.CompilerParams(
            dimension_semantics=("parallel",)),
    )(x1f, x2f, m_up, masks, w1p, b1p, w2a_x2, w2a_y1, b2ap, w2bp, b2bp)

    out = out_flat.reshape(Coutp, N, H2, W2)
    return jnp.transpose(out, (1, 0, 2, 3))[:, :Cout]      # NCHW, real channels


# ----------------------------------------------------------------------------
# Deterministic parameter init (PyTorch-like uniform(-1/sqrt(fan_in), +...)).
# Weights stored in HWIO (3, 3, Cin, Cout).
# ----------------------------------------------------------------------------
def _init_conv(key, cin, cout):
    kw, kb = jax.random.split(key)
    bound = 1.0 / math.sqrt(cin * 3 * 3)
    w = jax.random.uniform(kw, (3, 3, cin, cout), jnp.float32, -bound, bound)
    b = jax.random.uniform(kb, (cout,), jnp.float32, -bound, bound)
    return w, b


def make_params(up_in_ch, up_out_ch, cat_in_ch, cat_out_ch, key):
    k1, k2, k3 = jax.random.split(key, 3)
    w1, b1 = _init_conv(k1, up_in_ch, up_out_ch)
    w2a, b2a = _init_conv(k2, cat_in_ch, cat_out_ch)
    w2b, b2b = _init_conv(k3, cat_out_ch, cat_out_ch)
    return dict(w1=w1, b1=b1, w2a=w2a, b2a=b2a, w2b=w2b, b2b=b2b)


# ----------------------------------------------------------------------------
# Pure-JAX reference (independent formulation) for the correctness check.
# ----------------------------------------------------------------------------
def _upsample_idx(n):
    src = (jnp.arange(2 * n, dtype=jnp.float32) + 0.5) / 2.0 - 0.5
    src = jnp.maximum(src, 0.0)
    i0 = jnp.minimum(jnp.floor(src).astype(jnp.int32), n - 1)
    i1 = jnp.minimum(i0 + 1, n - 1)
    w1 = src - i0.astype(jnp.float32)
    return i0, i1, 1.0 - w1, w1


def _bilinear2x_ref(x):  # NCHW
    N, C, H, W = x.shape
    i0, i1, w0, w1 = _upsample_idx(H)
    x = x[:, :, i0, :] * w0[:, None] + x[:, :, i1, :] * w1[:, None]
    j0, j1, v0, v1 = _upsample_idx(W)
    x = x[:, :, :, j0] * v0 + x[:, :, :, j1] * v1
    return x


def _conv3x3_relu_ref(x_nchw, w_hwio, b):
    y = jax.lax.conv_general_dilated(
        x_nchw, w_hwio, window_strides=(1, 1), padding="SAME",
        dimension_numbers=("NCHW", "HWIO", "NCHW"))
    return jnp.maximum(y + b[None, :, None, None], 0.0)


def _up_forward_ref(x1, x2, params):
    x1 = _bilinear2x_ref(x1.astype(jnp.float32))
    x1 = _conv3x3_relu_ref(x1, params["w1"], params["b1"])
    x = jnp.concatenate([x2.astype(jnp.float32), x1], axis=1)
    x = _conv3x3_relu_ref(x, params["w2a"], params["b2a"])
    x = _conv3x3_relu_ref(x, params["w2b"], params["b2b"])
    return x


if __name__ == "__main__":
    # Module config: up(up_in_ch=4, up_out_ch=4, cat_in_ch=8, cat_out_ch=4)
    up_in_ch, up_out_ch = 4, 4
    x2_ch = 4
    cat_in_ch, cat_out_ch = x2_ch + up_out_ch, 4

    key = jax.random.PRNGKey(0)
    kx1, kx2, kp = jax.random.split(key, 3)

    N = 4                                           # folded 2 images / grid step
    x1 = jax.random.normal(kx1, (N, up_in_ch, 8, 8), jnp.float32)     # NCHW
    x2 = jax.random.normal(kx2, (N, x2_ch, 16, 16), jnp.float32)      # NCHW
    params = make_params(up_in_ch, up_out_ch, cat_in_ch, cat_out_ch, kp)

    out = jax.jit(up_forward)(x1, x2, params)
    out = jax.block_until_ready(out)
    assert out.shape == (N, cat_out_ch, 16, 16), out.shape

    # Correctness vs an independent pure-JAX f32 reference.  Tolerance loosened
    # for the bf16 MXU operands (f32 accumulation).
    ref = jax.block_until_ready(_up_forward_ref(x1, x2, params))
    err_max = float(jnp.max(jnp.abs(out - ref)))
    err_mean = float(jnp.mean(jnp.abs(out - ref)))
    assert err_max < 8e-2 and err_mean < 1e-2, (err_max, err_mean)

    print("KERNEL_OK")
</pallas_src>

<mosaic_0001>
module attributes {stable_mosaic.version = 11 : i64} {
  func.func @_up_fused_kernel(%arg0: i32, %arg1: memref<8x128xf32, #tpu.memory_space<vmem>>, %arg2: memref<8x512xf32, #tpu.memory_space<vmem>>, %arg3: memref<128x512xbf16, #tpu.memory_space<vmem>>, %arg4: memref<9x512xf32, #tpu.memory_space<vmem>>, %arg5: memref<8x72xbf16, #tpu.memory_space<vmem>>, %arg6: memref<8x1xf32, #tpu.memory_space<vmem>>, %arg7: memref<8x72xbf16, #tpu.memory_space<vmem>>, %arg8: memref<8x72xbf16, #tpu.memory_space<vmem>>, %arg9: memref<8x1xf32, #tpu.memory_space<vmem>>, %arg10: memref<8x72xbf16, #tpu.memory_space<vmem>>, %arg11: memref<8x1xf32, #tpu.memory_space<vmem>>, %arg12: memref<8x512xf32, #tpu.memory_space<vmem>>) attributes {dimension_semantics = [#tpu.dimension_semantics<parallel>], iteration_bounds = array<i64: 2>, scalar_prefetch = 0 : i64, scratch_operands = 0 : i64, tpu.core_type = #tpu.core_type<tc>, window_params = [{transform_indices = @transform_0, window_bounds = array<i64: 8, 128>}, {transform_indices = @transform_1, window_bounds = array<i64: 8, 512>}, {pipeline_mode = #tpu.pipeline_mode<synchronous>, transform_indices = @transform_2, window_bounds = array<i64: 128, 512>}, {pipeline_mode = #tpu.pipeline_mode<synchronous>, transform_indices = @transform_3, window_bounds = array<i64: 9, 512>}, {pipeline_mode = #tpu.pipeline_mode<synchronous>, transform_indices = @transform_4, window_bounds = array<i64: 8, 72>}, {pipeline_mode = #tpu.pipeline_mode<synchronous>, transform_indices = @transform_5, window_bounds = array<i64: 8, 1>}, {pipeline_mode = #tpu.pipeline_mode<synchronous>, transform_indices = @transform_6, window_bounds = array<i64: 8, 72>}, {pipeline_mode = #tpu.pipeline_mode<synchronous>, transform_indices = @transform_7, window_bounds = array<i64: 8, 72>}, {pipeline_mode = #tpu.pipeline_mode<synchronous>, transform_indices = @transform_8, window_bounds = array<i64: 8, 1>}, {pipeline_mode = #tpu.pipeline_mode<synchronous>, transform_indices = @transform_9, window_bounds = array<i64: 8, 72>}, {pipeline_mode = #tpu.pipeline_mode<synchronous>, transform_indices = @transform_10, window_bounds = array<i64: 8, 1>}, {transform_indices = @transform_11, window_bounds = array<i64: 8, 512>}]} {
    %c0 = arith.constant 0 : index
    %c0_0 = arith.constant 0 : index
    %0 = vector.load %arg4[%c0, %c0_0] : memref<9x512xf32, #tpu.memory_space<vmem>>, vector<9x512xf32>
    %1 = vector.extract_strided_slice %0 {offsets = [0, 0], sizes = [1, 512], strides = [1, 1]} : vector<9x512xf32> to vector<1x512xf32>
    %2 = vector.extract_strided_slice %0 {offsets = [1, 0], sizes = [1, 512], strides = [1, 1]} : vector<9x512xf32> to vector<1x512xf32>
    %3 = vector.extract_strided_slice %0 {offsets = [2, 0], sizes = [1, 512], strides = [1, 1]} : vector<9x512xf32> to vector<1x512xf32>
    %4 = vector.extract_strided_slice %0 {offsets = [3, 0], sizes = [1, 512], strides = [1, 1]} : vector<9x512xf32> to vector<1x512xf32>
    %5 = vector.extract_strided_slice %0 {offsets = [5, 0], sizes = [1, 512], strides = [1, 1]} : vector<9x512xf32> to vector<1x512xf32>
    %6 = vector.extract_strided_slice %0 {offsets = [6, 0], sizes = [1, 512], strides = [1, 1]} : vector<9x512xf32> to vector<1x512xf32>
    %7 = vector.extract_strided_slice %0 {offsets = [7, 0], sizes = [1, 512], strides = [1, 1]} : vector<9x512xf32> to vector<1x512xf32>
    %8 = vector.extract_strided_slice %0 {offsets = [8, 0], sizes = [1, 512], strides = [1, 1]} : vector<9x512xf32> to vector<1x512xf32>
    %c0_1 = arith.constant 0 : index
    %c0_2 = arith.constant 0 : index
    %9 = vector.load %arg1[%c0_1, %c0_2] : memref<8x128xf32, #tpu.memory_space<vmem>>, vector<8x128xf32>
    %10 = arith.truncf %9 : vector<8x128xf32> to vector<8x128xbf16>
    %c0_3 = arith.constant 0 : index
    %c0_4 = arith.constant 0 : index
    %11 = vector.load %arg3[%c0_3, %c0_4] : memref<128x512xbf16, #tpu.memory_space<vmem>>, vector<128x512xbf16>
    %cst = arith.constant dense<0.000000e+00> : vector<8x512xf32>
    %12 = tpu.matmul %10, %11, %cst {dimension_numbers = #tpu.dot_dimension_numbers<[1], [0], [0], [1], [0, 0, 1, 1], [], []>} : vector<8x128xbf16>, vector<128x512xbf16>, vector<8x512xf32> -> vector<8x512xf32>
    %c0_5 = arith.constant 0 : index
    %c0_6 = arith.constant 0 : index
    %13 = vector.load %arg5[%c0_5, %c0_6] : memref<8x72xbf16, #tpu.memory_space<vmem>>, vector<8x72xbf16>
    %c17_i32 = arith.constant 17 : i32
    %14 = tpu.dynamic_rotate %12 by %c17_i32 dim 1 : vector<8x512xf32>, i32 -> vector<8x512xf32>
    %15 = vector.broadcast %1 : vector<1x512xf32> to vector<8x512xf32>
    %16 = arith.mulf %14, %15 : vector<8x512xf32>
    %c16_i32 = arith.constant 16 : i32
    %17 = tpu.dynamic_rotate %12 by %c16_i32 dim 1 : vector<8x512xf32>, i32 -> vector<8x512xf32>
    %18 = vector.broadcast %2 : vector<1x512xf32> to vector<8x512xf32>
    %19 = arith.mulf %17, %18 : vector<8x512xf32>
    %c15_i32 = arith.constant 15 : i32
    %20 = tpu.dynamic_rotate %12 by %c15_i32 dim 1 : vector<8x512xf32>, i32 -> vector<8x512xf32>
    %21 = vector.broadcast %3 : vector<1x512xf32> to vector<8x512xf32>
    %22 = arith.mulf %20, %21 : vector<8x512xf32>
    %c1_i32 = arith.constant 1 : i32
    %23 = tpu.dynamic_rotate %12 by %c1_i32 dim 1 : vector<8x512xf32>, i32 -> vector<8x512xf32>
    %24 = vector.broadcast %4 : vector<1x512xf32> to vector<8x512xf32>
    %25 = arith.mulf %23, %24 : vector<8x512xf32>
    %c511_i32 = arith.constant 511 : i32
    %26 = tpu.dynamic_rotate %12 by %c511_i32 dim 1 : vector<8x512xf32>, i32 -> vector<8x512xf32>
    %27 = vector.broadcast %5 : vector<1x512xf32> to vector<8x512xf32>
    %28 = arith.mulf %26, %27 : vector<8x512xf32>
    %c497_i32 = arith.constant 497 : i32
    %29 = tpu.dynamic_rotate %12 by %c497_i32 dim 1 : vector<8x512xf32>, i32 -> vector<8x512xf32>
    %30 = vector.broadcast %6 : vector<1x512xf32> to vector<8x512xf32>
    %31 = arith.mulf %29, %30 : vector<8x512xf32>
    %c496_i32 = arith.constant 496 : i32
    %32 = tpu.dynamic_rotate %12 by %c496_i32 dim 1 : vector<8x512xf32>, i32 -> vector<8x512xf32>
    %33 = vector.broadcast %7 : vector<1x512xf32> to vector<8x512xf32>
    %34 = arith.mulf %32, %33 : vector<8x512xf32>
    %c495_i32 = arith.constant 495 : i32
    %35 = tpu.dynamic_rotate %12 by %c495_i32 dim 1 : vector<8x512xf32>, i32 -> vector<8x512xf32>
    %36 = vector.broadcast %8 : vector<1x512xf32> to vector<8x512xf32>
    %37 = arith.mulf %35, %36 : vector<8x512xf32>
    %38 = tpu.concatenate %16, %19, %22, %25, %12, %28, %31, %34, %37 in 0 : vector<8x512xf32>, vector<8x512xf32>, vector<8x512xf32>, vector<8x512xf32>, vector<8x512xf32>, vector<8x512xf32>, vector<8x512xf32>, vector<8x512xf32>, vector<8x512xf32> -> vector<72x512xf32>
    %39 = arith.truncf %38 : vector<72x512xf32> to vector<72x512xbf16>
    %cst_7 = arith.constant dense<0.000000e+00> : vector<8x512xf32>
    %40 = tpu.matmul %13, %39, %cst_7 {dimension_numbers = #tpu.dot_dimension_numbers<[1], [0], [0], [1], [0, 0, 1, 1], [], []>} : vector<8x72xbf16>, vector<72x512xbf16>, vector<8x512xf32> -> vector<8x512xf32>
    %c0_8 = arith.constant 0 : index
    %c0_9 = arith.constant 0 : index
    %41 = vector.load %arg6[%c0_8, %c0_9] : memref<8x1xf32, #tpu.memory_space<vmem>>, vector<8x1xf32>
    %42 = vector.broadcast %41 : vector<8x1xf32> to vector<8x512xf32>
    %43 = arith.addf %40, %42 : vector<8x512xf32>
    %cst_10 = arith.constant 0.000000e+00 : f32
    %44 = vector.broadcast %cst_10 : f32 to vector<8x512xf32>
    %45 = arith.maximumf %43, %44 : vector<8x512xf32>
    %c0_11 = arith.constant 0 : index
    %c0_12 = arith.constant 0 : index
    %46 = vector.load %arg7[%c0_11, %c0_12] : memref<8x72xbf16, #tpu.memory_space<vmem>>, vector<8x72xbf16>
    %c0_13 = arith.constant 0 : index
    %c0_14 = arith.constant 0 : index
    %47 = vector.load %arg2[%c0_13, %c0_14] : memref<8x512xf32, #tpu.memory_space<vmem>>, vector<8x512xf32>
    %c17_i32_15 = arith.constant 17 : i32
    %48 = tpu.dynamic_rotate %47 by %c17_i32_15 dim 1 : vector<8x512xf32>, i32 -> vector<8x512xf32>
    %49 = vector.broadcast %1 : vector<1x512xf32> to vector<8x512xf32>
    %50 = arith.mulf %48, %49 : vector<8x512xf32>
    %c16_i32_16 = arith.constant 16 : i32
    %51 = tpu.dynamic_rotate %47 by %c16_i32_16 dim 1 : vector<8x512xf32>, i32 -> vector<8x512xf32>
    %52 = vector.broadcast %2 : vector<1x512xf32> to vector<8x512xf32>
    %53 = arith.mulf %51, %52 : vector<8x512xf32>
    %c15_i32_17 = arith.constant 15 : i32
    %54 = tpu.dynamic_rotate %47 by %c15_i32_17 dim 1 : vector<8x512xf32>, i32 -> vector<8x512xf32>
    %55 = vector.broadcast %3 : vector<1x512xf32> to vector<8x512xf32>
    %56 = arith.mulf %54, %55 : vector<8x512xf32>
    %c1_i32_18 = arith.constant 1 : i32
    %57 = tpu.dynamic_rotate %47 by %c1_i32_18 dim 1 : vector<8x512xf32>, i32 -> vector<8x512xf32>
    %58 = vector.broadcast %4 : vector<1x512xf32> to vector<8x512xf32>
    %59 = arith.mulf %57, %58 : vector<8x512xf32>
    %c511_i32_19 = arith.constant 511 : i32
    %60 = tpu.dynamic_rotate %47 by %c511_i32_19 dim 1 : vector<8x512xf32>, i32 -> vector<8x512xf32>
    %61 = vector.broadcast %5 : vector<1x512xf32> to vector<8x512xf32>
    %62 = arith.mulf %60, %61 : vector<8x512xf32>
    %c497_i32_20 = arith.constant 497 : i32
    %63 = tpu.dynamic_rotate %47 by %c497_i32_20 dim 1 : vector<8x512xf32>, i32 -> vector<8x512xf32>
    %64 = vector.broadcast %6 : vector<1x512xf32> to vector<8x512xf32>
    %65 = arith.mulf %63, %64 : vector<8x512xf32>
    %c496_i32_21 = arith.constant 496 : i32
    %66 = tpu.dynamic_rotate %47 by %c496_i32_21 dim 1 : vector<8x512xf32>, i32 -> vector<8x512xf32>
    %67 = vector.broadcast %7 : vector<1x512xf32> to vector<8x512xf32>
    %68 = arith.mulf %66, %67 : vector<8x512xf32>
    %c495_i32_22 = arith.constant 495 : i32
    %69 = tpu.dynamic_rotate %47 by %c495_i32_22 dim 1 : vector<8x512xf32>, i32 -> vector<8x512xf32>
    %70 = vector.broadcast %8 : vector<1x512xf32> to vector<8x512xf32>
    %71 = arith.mulf %69, %70 : vector<8x512xf32>
    %72 = tpu.concatenate %50, %53, %56, %59, %47, %62, %65, %68, %71 in 0 : vector<8x512xf32>, vector<8x512xf32>, vector<8x512xf32>, vector<8x512xf32>, vector<8x512xf32>, vector<8x512xf32>, vector<8x512xf32>, vector<8x512xf32>, vector<8x512xf32> -> vector<72x512xf32>
    %73 = arith.truncf %72 : vector<72x512xf32> to vector<72x512xbf16>
    %cst_23 = arith.constant dense<0.000000e+00> : vector<8x512xf32>
    %74 = tpu.matmul %46, %73, %cst_23 {dimension_numbers = #tpu.dot_dimension_numbers<[1], [0], [0], [1], [0, 0, 1, 1], [], []>} : vector<8x72xbf16>, vector<72x512xbf16>, vector<8x512xf32> -> vector<8x512xf32>
    %c0_24 = arith.constant 0 : index
    %c0_25 = arith.constant 0 : index
    %75 = vector.load %arg8[%c0_24, %c0_25] : memref<8x72xbf16, #tpu.memory_space<vmem>>, vector<8x72xbf16>
    %c17_i32_26 = arith.constant 17 : i32
    %76 = tpu.dynamic_rotate %45 by %c17_i32_26 dim 1 : vector<8x512xf32>, i32 -> vector<8x512xf32>
    %77 = vector.broadcast %1 : vector<1x512xf32> to vector<8x512xf32>
    %78 = arith.mulf %76, %77 : vector<8x512xf32>
    %c16_i32_27 = arith.constant 16 : i32
    %79 = tpu.dynamic_rotate %45 by %c16_i32_27 dim 1 : vector<8x512xf32>, i32 -> vector<8x512xf32>
    %80 = vector.broadcast %2 : vector<1x512xf32> to vector<8x512xf32>
    %81 = arith.mulf %79, %80 : vector<8x512xf32>
    %c15_i32_28 = arith.constant 15 : i32
    %82 = tpu.dynamic_rotate %45 by %c15_i32_28 dim 1 : vector<8x512xf32>, i32 -> vector<8x512xf32>
    %83 = vector.broadcast %3 : vector<1x512xf32> to vector<8x512xf32>
    %84 = arith.mulf %82, %83 : vector<8x512xf32>
    %c1_i32_29 = arith.constant 1 : i32
    %85 = tpu.dynamic_rotate %45 by %c1_i32_29 dim 1 : vector<8x512xf32>, i32 -> vector<8x512xf32>
    %86 = vector.broadcast %4 : vector<1x512xf32> to vector<8x512xf32>
    %87 = arith.mulf %85, %86 : vector<8x512xf32>
    %c511_i32_30 = arith.constant 511 : i32
    %88 = tpu.dynamic_rotate %45 by %c511_i32_30 dim 1 : vector<8x512xf32>, i32 -> vector<8x512xf32>
    %89 = vector.broadcast %5 : vector<1x512xf32> to vector<8x512xf32>
    %90 = arith.mulf %88, %89 : vector<8x512xf32>
    %c497_i32_31 = arith.constant 497 : i32
    %91 = tpu.dynamic_rotate %45 by %c497_i32_31 dim 1 : vector<8x512xf32>, i32 -> vector<8x512xf32>
    %92 = vector.broadcast %6 : vector<1x512xf32> to vector<8x512xf32>
    %93 = arith.mulf %91, %92 : vector<8x512xf32>
    %c496_i32_32 = arith.constant 496 : i32
    %94 = tpu.dynamic_rotate %45 by %c496_i32_32 dim 1 : vector<8x512xf32>, i32 -> vector<8x512xf32>
    %95 = vector.broadcast %7 : vector<1x512xf32> to vector<8x512xf32>
    %96 = arith.mulf %94, %95 : vector<8x512xf32>
    %c495_i32_33 = arith.constant 495 : i32
    %97 = tpu.dynamic_rotate %45 by %c495_i32_33 dim 1 : vector<8x512xf32>, i32 -> vector<8x512xf32>
    %98 = vector.broadcast %8 : vector<1x512xf32> to vector<8x512xf32>
    %99 = arith.mulf %97, %98 : vector<8x512xf32>
    %100 = tpu.concatenate %78, %81, %84, %87, %45, %90, %93, %96, %99 in 0 : vector<8x512xf32>, vector<8x512xf32>, vector<8x512xf32>, vector<8x512xf32>, vector<8x512xf32>, vector<8x512xf32>, vector<8x512xf32>, vector<8x512xf32>, vector<8x512xf32> -> vector<72x512xf32>
    %101 = arith.truncf %100 : vector<72x512xf32> to vector<72x512xbf16>
    %cst_34 = arith.constant dense<0.000000e+00> : vector<8x512xf32>
    %102 = tpu.matmul %75, %101, %cst_34 {dimension_numbers = #tpu.dot_dimension_numbers<[1], [0], [0], [1], [0, 0, 1, 1], [], []>} : vector<8x72xbf16>, vector<72x512xbf16>, vector<8x512xf32> -> vector<8x512xf32>
    %103 = arith.addf %74, %102 : vector<8x512xf32>
    %c0_35 = arith.constant 0 : index
    %c0_36 = arith.constant 0 : index
    %104 = vector.load %arg9[%c0_35, %c0_36] : memref<8x1xf32, #tpu.memory_space<vmem>>, vector<8x1xf32>
    %105 = vector.broadcast %104 : vector<8x1xf32> to vector<8x512xf32>
    %106 = arith.addf %103, %105 : vector<8x512xf32>
    %cst_37 = arith.constant 0.000000e+00 : f32
    %107 = vector.broadcast %cst_37 : f32 to vector<8x512xf32>
    %108 = arith.maximumf %106, %107 : vector<8x512xf32>
    %c0_38 = arith.constant 0 : index
    %c0_39 = arith.constant 0 : index
    %109 = vector.load %arg10[%c0_38, %c0_39] : memref<8x72xbf16, #tpu.memory_space<vmem>>, vector<8x72xbf16>
    %c17_i32_40 = arith.constant 17 : i32
    %110 = tpu.dynamic_rotate %108 by %c17_i32_40 dim 1 : vector<8x512xf32>, i32 -> vector<8x512xf32>
    %111 = vector.broadcast %1 : vector<1x512xf32> to vector<8x512xf32>
    %112 = arith.mulf %110, %111 : vector<8x512xf32>
    %c16_i32_41 = arith.constant 16 : i32
    %113 = tpu.dynamic_rotate %108 by %c16_i32_41 dim 1 : vector<8x512xf32>, i32 -> vector<8x512xf32>
    %114 = vector.broadcast %2 : vector<1x512xf32> to vector<8x512xf32>
    %115 = arith.mulf %113, %114 : vector<8x512xf32>
    %c15_i32_42 = arith.constant 15 : i32
    %116 = tpu.dynamic_rotate %108 by %c15_i32_42 dim 1 : vector<8x512xf32>, i32 -> vector<8x512xf32>
    %117 = vector.broadcast %3 : vector<1x512xf32> to vector<8x512xf32>
    %118 = arith.mulf %116, %117 : vector<8x512xf32>
    %c1_i32_43 = arith.constant 1 : i32
    %119 = tpu.dynamic_rotate %108 by %c1_i32_43 dim 1 : vector<8x512xf32>, i32 -> vector<8x512xf32>
    %120 = vector.broadcast %4 : vector<1x512xf32> to vector<8x512xf32>
    %121 = arith.mulf %119, %120 : vector<8x512xf32>
    %c511_i32_44 = arith.constant 511 : i32
    %122 = tpu.dynamic_rotate %108 by %c511_i32_44 dim 1 : vector<8x512xf32>, i32 -> vector<8x512xf32>
    %123 = vector.broadcast %5 : vector<1x512xf32> to vector<8x512xf32>
    %124 = arith.mulf %122, %123 : vector<8x512xf32>
    %c497_i32_45 = arith.constant 497 : i32
    %125 = tpu.dynamic_rotate %108 by %c497_i32_45 dim 1 : vector<8x512xf32>, i32 -> vector<8x512xf32>
    %126 = vector.broadcast %6 : vector<1x512xf32> to vector<8x512xf32>
    %127 = arith.mulf %125, %126 : vector<8x512xf32>
    %c496_i32_46 = arith.constant 496 : i32
    %128 = tpu.dynamic_rotate %108 by %c496_i32_46 dim 1 : vector<8x512xf32>, i32 -> vector<8x512xf32>
    %129 = vector.broadcast %7 : vector<1x512xf32> to vector<8x512xf32>
    %130 = arith.mulf %128, %129 : vector<8x512xf32>
    %c495_i32_47 = arith.constant 495 : i32
    %131 = tpu.dynamic_rotate %108 by %c495_i32_47 dim 1 : vector<8x512xf32>, i32 -> vector<8x512xf32>
    %132 = vector.broadcast %8 : vector<1x512xf32> to vector<8x512xf32>
    %133 = arith.mulf %131, %132 : vector<8x512xf32>
    %134 = tpu.concatenate %112, %115, %118, %121, %108, %124, %127, %130, %133 in 0 : vector<8x512xf32>, vector<8x512xf32>, vector<8x512xf32>, vector<8x512xf32>, vector<8x512xf32>, vector<8x512xf32>, vector<8x512xf32>, vector<8x512xf32>, vector<8x512xf32> -> vector<72x512xf32>
    %135 = arith.truncf %134 : vector<72x512xf32> to vector<72x512xbf16>
    %cst_48 = arith.constant dense<0.000000e+00> : vector<8x512xf32>
    %136 = tpu.matmul %109, %135, %cst_48 {dimension_numbers = #tpu.dot_dimension_numbers<[1], [0], [0], [1], [0, 0, 1, 1], [], []>} : vector<8x72xbf16>, vector<72x512xbf16>, vector<8x512xf32> -> vector<8x512xf32>
    %c0_49 = arith.constant 0 : index
    %c0_50 = arith.constant 0 : index
    %137 = vector.load %arg11[%c0_49, %c0_50] : memref<8x1xf32, #tpu.memory_space<vmem>>, vector<8x1xf32>
    %138 = vector.broadcast %137 : vector<8x1xf32> to vector<8x512xf32>
    %139 = arith.addf %136, %138 : vector<8x512xf32>
    %cst_51 = arith.constant 0.000000e+00 : f32
    %140 = vector.broadcast %cst_51 : f32 to vector<8x512xf32>
    %141 = arith.maximumf %139, %140 : vector<8x512xf32>
    %c0_52 = arith.constant 0 : index
    %c0_53 = arith.constant 0 : index
    %142 = vector.load %arg12[%c0_52, %c0_53] : memref<8x512xf32, #tpu.memory_space<vmem>>, vector<8x512xf32>
    tpu.vector_store %arg12[%c0_52, %c0_53], %141 {strides = array<i32>} : memref<8x512xf32, #tpu.memory_space<vmem>>, vector<8x512xf32>,
    return
  }
  func.func @transform_0(%arg0: i32) -> (i32, i32) {
    %c0_i32 = arith.constant 0 : i32
    %c0_i32_0 = arith.constant 0 : i32
    return %c0_i32, %arg0 : i32, i32
  }
  func.func @transform_1(%arg0: i32) -> (i32, i32) {
    %c0_i32 = arith.constant 0 : i32
    %c0_i32_0 = arith.constant 0 : i32
    return %c0_i32, %arg0 : i32, i32
  }
  func.func @transform_2(%arg0: i32) -> (i32, i32) {
    %c0_i32 = arith.constant 0 : i32
    %c0_i32_0 = arith.constant 0 : i32
    %c0_i32_1 = arith.constant 0 : i32
    return %c0_i32, %c0_i32_0 : i32, i32
  }
  func.func @transform_3(%arg0: i32) -> (i32, i32) {
    %c0_i32 = arith.constant 0 : i32
    %c0_i32_0 = arith.constant 0 : i32
    %c0_i32_1 = arith.constant 0 : i32
    return %c0_i32, %c0_i32_0 : i32, i32
  }
  func.func @transform_4(%arg0: i32) -> (i32, i32) {
    %c0_i32 = arith.constant 0 : i32
    %c0_i32_0 = arith.constant 0 : i32
    %c0_i32_1 = arith.constant 0 : i32
    return %c0_i32, %c0_i32_0 : i32, i32
  }
  func.func @transform_5(%arg0: i32) -> (i32, i32) {
    %c0_i32 = arith.constant 0 : i32
    %c0_i32_0 = arith.constant 0 : i32
    %c0_i32_1 = arith.constant 0 : i32
    return %c0_i32, %c0_i32_0 : i32, i32
  }
  func.func @transform_6(%arg0: i32) -> (i32, i32) {
    %c0_i32 = arith.constant 0 : i32
    %c0_i32_0 = arith.constant 0 : i32
    %c0_i32_1 = arith.constant 0 : i32
    return %c0_i32, %c0_i32_0 : i32, i32
  }
  func.func @transform_7(%arg0: i32) -> (i32, i32) {
    %c0_i32 = arith.constant 0 : i32
    %c0_i32_0 = arith.constant 0 : i32
    %c0_i32_1 = arith.constant 0 : i32
    return %c0_i32, %c0_i32_0 : i32, i32
  }
  func.func @transform_8(%arg0: i32) -> (i32, i32) {
    %c0_i32 = arith.constant 0 : i32
    %c0_i32_0 = arith.constant 0 : i32
    %c0_i32_1 = arith.constant 0 : i32
    return %c0_i32, %c0_i32_0 : i32, i32
  }
  func.func @transform_9(%arg0: i32) -> (i32, i32) {
    %c0_i32 = arith.constant 0 : i32
    %c0_i32_0 = arith.constant 0 : i32
    %c0_i32_1 = arith.constant 0 : i32
    return %c0_i32, %c0_i32_0 : i32, i32
  }
  func.func @transform_10(%arg0: i32) -> (i32, i32) {
    %c0_i32 = arith.constant 0 : i32
    %c0_i32_0 = arith.constant 0 : i32
    %c0_i32_1 = arith.constant 0 : i32
    return %c0_i32, %c0_i32_0 : i32, i32
  }
  func.func @transform_11(%arg0: i32) -> (i32, i32) {
    %c0_i32 = arith.constant 0 : i32
    %c0_i32_0 = arith.constant 0 : i32
    return %c0_i32, %arg0 : i32, i32
  }
}

</mosaic_0001>

<bundles_post_ra>
// kernel: up_forward.1
= control target key start
LH: loop header
LB: loop body
LE: loop exit
PB: predicated region body
PF: predicated region fallthrough
CT: control target
= control target key end

     0   :  { %s2141_s17 = smov 0   ;;  %s3391_s0 = inlined_call_operand.vmem [shape: f32[8,256], index: 0, kind: input, shape index: {}]   ;;  %s3392_s1 = inlined_call_operand.vmem [shape: f32[8,1024], index: 1, kind: input, shape index: {}]   ;;  %s3393_s2 = inlined_call_operand.vmem [shape: bf16[128,512], index: 2, kind: input, shape index: {}]   ;;  %s3394_s3 = inlined_call_operand.vmem [shape: f32[9,512], index: 3, kind: input, shape index: {}]   ;;  %s3395_s4 = inlined_call_operand.vmem [shape: bf16[8,72], index: 4, kind: input, shape index: {}]   ;;  %s3396_s5 = inlined_call_operand.vmem [shape: f32[8,1], index: 5, kind: input, shape index: {}]   ;;  %s3397_s6 = inlined_call_operand.vmem [shape: bf16[8,72], index: 6, kind: input, shape index: {}]   ;;  %s3398_s7 = inlined_call_operand.vmem [shape: bf16[8,72], index: 7, kind: input, shape index: {}]   ;;  %s3399_s8 = inlined_call_operand.vmem [shape: f32[8,1], index: 8, kind: input, shape index: {}]   ;;  %s3400_s9 = inlined_call_operand.vmem [shape: bf16[8,72], index: 9, kind: input, shape index: {}]   ;;  %s3401_s10 = inlined_call_operand.vmem [shape: f32[8,1], index: 10, kind: input, shape index: {}]   ;;  %s3402_s11 = inlined_call_operand.vmem [shape: f32[8,1024], index: 11, kind: output, shape index: {}]  }
   0x1 LB: > { %s2147_s18 = sadd.s32 4294967295, %s2070_s17   ;;  %p1930_p0 = scmp.ge.s32.totalorder %s2070_s17, 1  ;;  %s2070_s17 = sphi %s2141_s17, %s21_s17  }
   0x2   : > { %p347_p1 = scmp.lt.s32.totalorder %s2070_s17, 3 }
   0x4   : > { %p348_p2 = pnand %p1930_p0, %p347_p1 }
   0x6   : > { %351 = sbr.rel (%p348_p2) target bundleno = 1411 (0x583), region = 64 }
   0xb   : > { %v2009_v0 = vld [vmem:[%s3393_s2 + $0xe4] ss:$16 sps:$4 sm:$0xff]   ;;  %v2011_v1 = vld [vmem:[%s3393_s2 + $0xec] ss:$16 sps:$4 sm:$0xff]   ;;  %v3403_v2 = vmov 0   ;;  %p391_p3 = scmp.lt.s32.totalorder %s2147_s18, 1  ;;  %v701_v56 = vlaneseq }
   0xc   : > { %642 = vmatprep.mubr.bf16.mxu0 %v3403_v2  ;;  %683 = vmatprep.mubr.bf16.mxu1 %v3403_v2  ;;  %v2013_v3 = vld [vmem:[%s3393_s2 + $0xe0] ss:$16 sps:$4 sm:$0xff]   ;;  %v2014_v4 = vld [vmem:[%s3393_s2 + $0xe8] ss:$16 sps:$4 sm:$0xff]   ;;  %v2015_v5 = vld [vmem:[%s3393_s2 + $0xc4] ss:$16 sps:$4 sm:$0xff]  }
   0xd   : > { %610 = vmatprep.subr.bf16.mxu0 %v2009_v0  ;;  %2007 = vset.pattern.permute.xlu0 %v3403_v2  ;;  %v2017_v6 = vld [vmem:[%s3393_s2 + $0xcc] ss:$16 sps:$4 sm:$0xff]   ;;  %v2019_v7 = vld [vmem:[%s3393_s2 + $0xc0] ss:$16 sps:$4 sm:$0xff]   ;;  %v2020_v8 = vld [vmem:[%s3393_s2 + $0xc8] ss:$16 sps:$4 sm:$0xff]  }
   0xe   : > { %651 = vmatprep.subr.bf16.mxu1 %v2011_v1  ;;  %2008 = vset.pattern.permute.xlu1 %v3403_v2  ;;  %v2021_v9 = vld [vmem:[%s3393_s2 + $0xa4] ss:$16 sps:$4 sm:$0xff]   ;;  %v2023_v10 = vld [vmem:[%s3393_s2 + $0xac] ss:$16 sps:$4 sm:$0xff]   ;;  %v2025_v11 = vld [vmem:[%s3393_s2 + $0xa0] ss:$16 sps:$4 sm:$0xff]  }
   0xf   : > { %611 = vmatpush1.bf16.msra.mxu0 %v2013_v3  ;;  %652 = vmatpush1.bf16.msra.mxu1 %v2014_v4  ;;  %v2026_v12 = vld [vmem:[%s3393_s2 + $0xa8] ss:$16 sps:$4 sm:$0xff]   ;;  %v2027_v13 = vld [vmem:[%s3393_s2 + $0x84] ss:$16 sps:$4 sm:$0xff]   ;;  %v2029_v14 = vld [vmem:[%s3393_s2 + $0x8c] ss:$16 sps:$4 sm:$0xff]  }
  0x10   : > { %612 = vmatprep.subr.bf16.mxu0 %v2015_v5  ;;  %653 = vmatprep.subr.bf16.mxu1 %v2017_v6  ;;  %v2031_v15 = vld [vmem:[%s3393_s2 + $0x80] ss:$16 sps:$4 sm:$0xff]   ;;  %v2032_v16 = vld [vmem:[%s3393_s2 + $0x88] ss:$16 sps:$4 sm:$0xff]   ;;  %v2033_v17 = vld [vmem:[%s3393_s2 + $0x64] ss:$16 sps:$4 sm:$0xff]  }
  0x11   : > { %v2035_v18 = vld [vmem:[%s3393_s2 + $0x6c] ss:$16 sps:$4 sm:$0xff]   ;;  %v2037_v19 = vld [vmem:[%s3393_s2 + $0x60] ss:$16 sps:$4 sm:$0xff]   ;;  %v2038_v20 = vld [vmem:[%s3393_s2 + $0x68] ss:$16 sps:$4 sm:$0xff]  }
  0x12   : > { %v2039_v21 = vld [vmem:[%s3393_s2 + $0x44] ss:$16 sps:$4 sm:$0xff]   ;;  %v2041_v22 = vld [vmem:[%s3393_s2 + $0x4c] ss:$16 sps:$4 sm:$0xff]   ;;  %s392_s29 = scalar_select %p391_p3, %s2147_s18, 1  ;;  %v2412_v59 = vand.u32 127, %v701_v56 }
  0x13   : > { %613 = vmatpush1.bf16.msra.mxu0 %v2019_v7  ;;  %654 = vmatpush1.bf16.msra.mxu1 %v2020_v8  ;;  %v2043_v23 = vld [vmem:[%s3393_s2 + $0x40] ss:$16 sps:$4 sm:$0xff]   ;;  %v2044_v24 = vld [vmem:[%s3393_s2 + $0x48] ss:$16 sps:$4 sm:$0xff]   ;;  %v2045_v25 = vld [vmem:[%s3393_s2 + $0x24] ss:$16 sps:$4 sm:$0xff]  }
  0x14   : > { %614 = vmatprep.subr.bf16.mxu0 %v2021_v9  ;;  %655 = vmatprep.subr.bf16.mxu1 %v2023_v10  ;;  %v2047_v26 = vld [vmem:[%s3393_s2 + $0x2c] ss:$16 sps:$4 sm:$0xff]   ;;  %s1931_s21 = sshll.u32 %s392_s29, 3  ;;  %v2049_v27 = vld [vmem:[%s3393_s2 + $0x20] ss:$16 sps:$4 sm:$0xff]   ;;  %s2073_s20 = smov 111  }
  0x15   : > { %v2050_v28 = vld [vmem:[%s3393_s2 + $0x28] ss:$16 sps:$4 sm:$0xff]   ;;  %v2051_v29 = vld [vmem:[%s3393_s2 + $0x4] ss:$16 sps:$4 sm:$0xff]   ;;  %v2053_v30 = vld [vmem:[%s3393_s2 + $0xc] ss:$16 sps:$4 sm:$0xff]   ;;  %s394_s13 = scalar_lea.vmem %s3391_s0, %s1931_s21 }
  0x16   : > { %v2055_v31 = vld [vmem:[%s3393_s2] ss:$16 sps:$4 sm:$0xff]   ;;  %v2056_v32 = vld [vmem:[%s3393_s2 + $0x8] ss:$16 sps:$4 sm:$0xff]   ;;  %s2074_s21 = smov 113   ;;  %s2075_s22 = smov 112  }
  0x17   : > { %615 = vmatpush1.bf16.msra.mxu0 %v2025_v11  ;;  %656 = vmatpush1.bf16.msra.mxu1 %v2026_v12  ;;  %v416_v33 = vld [vmem:[%s394_s13] sm:$0xff]  ;;  %s2076_s23 = smov 127   ;;  %s2077_s24 = smov 15   ;;  %vm934_vm0 = vcmp.lt.s32.totalorder %v2412_v59, 111  ;;  %v2422_v62 = vld [vmem:[%s3394_s3 + $0x30] ss:$0 sm:$0xff] }
  0x18   : > { %616 = vmatprep.subr.bf16.mxu0 %v2027_v13  ;;  %657 = vmatprep.subr.bf16.mxu1 %v2029_v14  ;;  %v417_v34 = vpack.c.bf16 %v416_v33, %v416_v33  ;;  %s2078_s25 = smov 1   ;;  %s2079_s26 = smov 17   ;;  %v979_v43 = vld [vmem:[%s3396_s5] sm:$0xff]  ;;  %3442 = vst [vmem:[#allocation3_spill] sm:$0xff] %v2422_v62  ;;  %v2427_v63 = vld [vmem:[%s3394_s3 + $0x38] ss:$0 sm:$0xff] }
  0x19   : > { %s2080_s27 = smov 16   ;;  %s1932_s28 = sshll.u32 %s2147_s18, 2  ;;  %3443 = vst [vmem:[#allocation4_spill] sm:$0xff] %v2427_v63  ;;  %v709_v3 = vshrl.u32 %v701_v56, 7  ;;  %vm989_vm1 = vcmask 1043456   ;;  %v2444_v13 = vld [vmem:[%s3394_s3 + $0x10] sm:$0xff] }
  0x1a   : > { %p396_p4 = scmp.lt.s32.totalorder %s1932_s28, 7  ;;  %v2449_v14 = vld [vmem:[%s3394_s3 + $0x18] sm:$0xff]  ;;  %vm901_vm2 = vcmp.lt.s32.totalorder %v2412_v59, 112  ;;  %vm835_vm3 = vcmp.lt.s32.totalorder %v2412_v59, 127  ;;  %vm868_vm4 = vcmp.lt.s32.totalorder %v2412_v59, 113  ;;  %vm769_vm5 = vcmp.lt.s32.totalorder %v2412_v59, 15 }
  0x1b   : > { %617 = vmatpush1.bf16.msra.mxu0 %v2031_v15  ;;  %658 = vmatpush1.bf16.msra.mxu1 %v2032_v16  ;;  %v908_v10 = vsub.s32 7, %v709_v3  ;;  %v842_v16 = vsub.s32 5, %v709_v3  ;;  %vm802_vm6 = vcmp.lt.s32.totalorder %v2412_v59, 1  ;;  %vm703_vm7 = vcmp.lt.s32.totalorder %v2412_v59, 17 }
  0x1c   : > { %618 = vmatprep.subr.bf16.mxu0 %v2033_v17  ;;  %659 = vmatprep.subr.bf16.mxu1 %v2035_v18  ;;  %s3508_s28 = smov (!%p396_p4, %s1932_s28), 7  ;;  %v2456_v17 = vld [vmem:[%s3394_s3 + $0x20] ss:$0 sm:$0xff]  ;;  %v2461_v18 = vld [vmem:[%s3394_s3 + $0x28] ss:$0 sm:$0xff]  ;;  %vm736_vm8 = vcmp.lt.s32.totalorder %v2412_v59, 16 }
  0x1d   : > { %s1933_s12 = sshll.u32 %s3508_s28, 3  ;;  %3444 = vst [vmem:[#allocation5_spill] sm:$0xff] %v2456_v17  ;;  %3445 = vst [vmem:[#allocation6_spill] sm:$0xff] %v2461_v18  ;;  %v2491_v33 = vrot.slane %v2449_v14, %v842_v16  ;;  %vm985_vm9 = vcmask 588800  }
  0x1e   : > { %s2342_s18 = scalar_lea.vmem %s3392_s1, %s1933_s12 }
  0x1f   : > { %619 = vmatpush1.bf16.msra.mxu0 %v2037_v19  ;;  %660 = vmatpush1.bf16.msra.mxu1 %v2038_v20  ;;  %v2345_v44 = vld [vmem:[%s2342_s18 + $0x8] sm:$0xff]  ;;  %v2350_v45 = vld [vmem:[%s2342_s18] sm:$0xff]  ;;  %v2353_v46 = vld [vmem:[%s2342_s18 + $0x18] sm:$0xff]  ;;  %v2463_v19 = vsub.s32 2, %v709_v3  ;;  %v2467_v20 = vrot.slane %v2444_v13, %v908_v10 }
  0x20   : > { %620 = vmatprep.subr.bf16.mxu0 %v2039_v21  ;;  %661 = vmatprep.subr.bf16.mxu1 %v2041_v22  ;;  %3441 = vst [vmem:[#allocation2_spill] sm:$0xff] %v2345_v44  ;;  %v2360_v47 = vld [vmem:[%s2342_s18 + $0x10] sm:$0xff] }
  0x23   : > { %621 = vmatpush1.bf16.msra.mxu0 %v2043_v23  ;;  %662 = vmatpush1.bf16.msra.mxu1 %v2044_v24  ;;  %v409_v23 = vld [vmem:[%s3394_s3 + $0x8] sm:$0xff]  ;;  %v875_v24 = vsub.s32 6, %v709_v3 }
  0x24   : > { %622 = vmatprep.subr.bf16.mxu0 %v2045_v25  ;;  %663 = vmatprep.subr.bf16.mxu1 %v2047_v26  ;;  %v2473_v25 = vrot.slane %v2449_v14, %v908_v10 }
  0x25   : > { %v2509_v56 = vrot.slane %v409_v23, %v875_v24 }
  0x27   : > { %623 = vmatpush1.bf16.msra.mxu0 %v2049_v27  ;;  %664 = vmatpush1.bf16.msra.mxu1 %v2050_v28  ;;  %v2482_v28 = vld [vmem:[%s3394_s3] sm:$0xff] }
  0x28   : > { %624 = vmatprep.subr.bf16.mxu0 %v2051_v29  ;;  %665 = vmatprep.subr.bf16.mxu1 %v2053_v30  ;;  %v809_v29 = vsub.s32 3, %v709_v3  ;;  %v2486_v30 = vrot.slane %v2444_v13, %v842_v16 }
  0x2a   : > { %3446 = vst [vmem:[#allocation7_spill] sm:$0xff] %v2486_v30 }
  0x2b   : > { %625 = vmatpush1.bf16.msra.mxu0 %v2055_v31  ;;  %666 = vmatpush1.bf16.msra.mxu1 %v2056_v32 }
  0x2e   : > { %643 = vmatmul.mubr.bf16.vlgmr.msra.gmra.mxu0 %v417_v34  ;;  %684 = vmatmul.mubr.bf16.vlgmr.msra.gmra.mxu1 %v417_v34  ;;  %v2494_v34 = vrot.slane %v409_v23, %v2463_v19 }
  0x2f   : > { %1034 = vmatprep.mubr.bf16.mxu0 %v3403_v2  ;;  %1075 = vmatprep.mubr.bf16.mxu1 %v3403_v2 }
  0xee   : > { %v2258_v35 = vpop.f32.mrf.mxu0  ;;  %v2260_v36 = vpop.f32.mrf.mxu1 }
  0xef   : > { %930 = vrot.lane.b32.xlu1 %v2260_v36, %s2073_s20  ;;  %926 = vrot.lane.b32.xlu0 %v2258_v35, %s2073_s20 }
  0xf0   : > { %v2266_v37 = vpop.f32.mrf.mxu0  ;;  %v2268_v38 = vpop.f32.mrf.mxu1 }
  0xf2   : > { %v648_v39 = vpop.f32.mrf.mxu0  ;;  %v689_v40 = vpop.f32.mrf.mxu1 }
  0xf3   : > { %864 = vrot.lane.b32.xlu1 %v2260_v36, %s2074_s21  ;;  %860 = vrot.lane.b32.xlu0 %v2258_v35, %s2074_s21  ;;  %v2498_v39 = vrot.slane %v2444_v13, %v2463_v19 }
  0xf4   : > { %v649_v41 = vpop.f32.mrf.mxu0  ;;  %v690_v42 = vpop.f32.mrf.mxu1 }
  0xf7   : > { %897 = vrot.lane.b32.xlu1 %v2260_v36, %s2075_s22  ;;  %827 = vrot.lane.b32.xlu0 %v2258_v35, %s2076_s23 }
  0xfb   : > { %893 = vrot.lane.b32.xlu1 %v2258_v35, %s2075_s22  ;;  %761 = vrot.lane.b32.xlu0 %v2258_v35, %s2077_s24 }
  0xff   : > { %831 = vrot.lane.b32.xlu1 %v2260_v36, %s2076_s23  ;;  %794 = vrot.lane.b32.xlu0 %v2258_v35, %s2078_s25 }
 0x103   : > { %798 = vrot.lane.b32.xlu1 %v2260_v36, %s2078_s25  ;;  %765 = vrot.lane.b32.xlu0 %v2260_v36, %s2077_s24 }
 0x107   : > { %932 = vrot.lane.b32.xlu1 %v2268_v38, %s2073_s20  ;;  %693 = vrot.lane.b32.xlu0 %v2258_v35, %s2079_s26 }
 0x10b   : > { %899 = vrot.lane.b32.xlu1 %v2268_v38, %s2075_s22  ;;  %728 = vrot.lane.b32.xlu0 %v2258_v35, %s2080_s27 }
 0x10f   : > { %833 = vrot.lane.b32.xlu1 %v2268_v38, %s2076_s23  ;;  %928 = vrot.lane.b32.xlu0 %v2266_v37, %s2073_s20 }
 0x113   : > { %763 = vrot.lane.b32.xlu1 %v2266_v37, %s2077_s24  ;;  %862 = vrot.lane.b32.xlu0 %v2266_v37, %s2074_s21 }
 0x117   : > { %796 = vrot.lane.b32.xlu1 %v2266_v37, %s2078_s25  ;;  %895 = vrot.lane.b32.xlu0 %v2266_v37, %s2075_s22 }
 0x11b   : > { %800 = vrot.lane.b32.xlu1 %v2268_v38, %s2078_s25  ;;  %866 = vrot.lane.b32.xlu0 %v2268_v38, %s2074_s21 }
 0x11f   : > { %695 = vrot.lane.b32.xlu1 %v2266_v37, %s2079_s26  ;;  %829 = vrot.lane.b32.xlu0 %v2266_v37, %s2076_s23 }
 0x123   : > { %730 = vrot.lane.b32.xlu1 %v2266_v37, %s2080_s27  ;;  %767 = vrot.lane.b32.xlu0 %v2268_v38, %s2077_s24 }
 0x127   : > { %734 = vrot.lane.b32.xlu1 %v2268_v38, %s2080_s27  ;;  %699 = vrot.lane.b32.xlu0 %v2268_v38, %s2079_s26 }
 0x12b   : > { %732 = vrot.lane.b32.xlu1 %v2260_v36, %s2080_s27  ;;  %697 = vrot.lane.b32.xlu0 %v2260_v36, %s2079_s26 }
 0x12f   : > { %982 = vperm.xlu0 %2007, %v979_v43   ;;  %1207 = vrot.lane.b32.xlu1 %v2345_v44, %s2073_s20  ;;  %v2505_v43 = vrot.slane %v2482_v28, %v875_v24 }
 0x133   : > { %1205 = vrot.lane.b32.xlu0 %v2350_v45, %s2073_s20  ;;  %1211 = vrot.lane.b32.xlu1 %v2353_v46, %s2073_s20 }
 0x137   : > { %1209 = vrot.lane.b32.xlu0 %v2360_v47, %s2073_s20  ;;  %1177 = vrot.lane.b32.xlu1 %v2360_v47, %s2074_s21 }
 0x13b   : > { %1175 = vrot.lane.b32.xlu0 %v2345_v44, %s2074_s21  ;;  %1193 = vrot.lane.b32.xlu1 %v2360_v47, %s2075_s22 }
 0x13f   : > { %1191 = vrot.lane.b32.xlu0 %v2345_v44, %s2075_s22  ;;  %1189 = vrot.lane.b32.xlu1 %v2350_v45, %s2075_s22 }
 0x143   : > { %1173 = vrot.lane.b32.xlu0 %v2350_v45, %s2074_s21  ;;  %1195 = vrot.lane.b32.xlu1 %v2353_v46, %s2075_s22 }
 0x147   : > { %1179 = vrot.lane.b32.xlu0 %v2353_v46, %s2074_s21  ;;  %1161 = vrot.lane.b32.xlu1 %v2360_v47, %s2076_s23 }
 0x14b   : > { %1159 = vrot.lane.b32.xlu0 %v2345_v44, %s2076_s23  ;;  %1163 = vrot.lane.b32.xlu1 %v2353_v46, %s2076_s23 }
 0x14f   : > { %1157 = vrot.lane.b32.xlu0 %v2350_v45, %s2076_s23  ;;  %1127 = vrot.lane.b32.xlu1 %v2345_v44, %s2077_s24 }
 0x153   : > { %1125 = vrot.lane.b32.xlu0 %v2350_v45, %s2077_s24  ;;  %1143 = vrot.lane.b32.xlu1 %v2345_v44, %s2078_s25 }
 0x157   : > { %1141 = vrot.lane.b32.xlu0 %v2350_v45, %s2078_s25 }
 0x161   : > { %v931_v48 = vpop.permute.xlu1 %930  ;;  %v927_v49 = vpop.permute.xlu0 %926 }
 0x165   : > { %v2396_v50 = vpop.permute.xlu1 %864  ;;  %v2398_v51 = vpop.permute.xlu0 %860 }
 0x169   : > { %v2400_v52 = vpop.permute.xlu1 %897  ;;  %v2402_v53 = vpop.permute.xlu0 %827 }
 0x16d   : > { %v2404_v54 = vpop.permute.xlu1 %893  ;;  %v2406_v55 = vpop.permute.xlu0 %761 }
 0x171   : > { %v2408_v57 = vpop.permute.xlu1 %831  ;;  %v2410_v58 = vpop.permute.xlu0 %794 }
 0x175   : > { %v2414_v60 = vpop.permute.xlu1 %798  ;;  %v2416_v61 = vpop.permute.xlu0 %765 }
 0x179   : > { %v933_v0 = vpop.permute.xlu1 %932  ;;  %v2429_v1 = vpop.permute.xlu0 %693 }
 0x17a   : > { %v935_v4 = vsel %vm934_vm0, %v931_v48, %v933_v0  ;;  %v938_v5 = vsel %vm934_vm0, %v933_v0, %v927_v49  ;;  %v2512_v0 = vrot.slane %v409_v23, %v809_v29 }
 0x17b   : > { %v957_v6 = vmul.f32 %v2422_v62, %v935_v4  ;;  %v958_v7 = vmul.f32 %v2427_v63, %v938_v5  ;;  %v2515_v4 = vrot.slane %v2444_v13, %v809_v29  ;;  %v2519_v5 = vrot.slane %v2482_v28, %v908_v10 }
 0x17d   : > { %v977_v8 = vpack.c.bf16 %v957_v6, %v957_v6  ;;  %v978_v9 = vpack.c.bf16 %v958_v7, %v958_v7  ;;  %v2437_v11 = vpop.permute.xlu1 %899  ;;  %v2439_v12 = vpop.permute.xlu0 %728  ;;  %v2521_v6 = vrot.slane %v409_v23, %v908_v10  ;;  %v2524_v7 = vrot.slane %v2482_v28, %v809_v29 }
 0x17f   : > { %1974 = vmatprep.subr.msk.bf16.mxu1 %vm989_vm1, %v978_v9  ;;  %v997_v15 = vsel %vm989_vm1, %v977_v8, 0  ;;  %v2527_v8 = vrot.slane %v2449_v14, %v809_v29  ;;  %v2542_v29 = vrot.slane %v2449_v14, %v875_v24 }
 0x180   : > { %1050 = vmatpush1.bf16.msra.mxu1 %v997_v15 }
 0x181   : > { %v834_v21 = vpop.permute.xlu1 %833  ;;  %v929_v22 = vpop.permute.xlu0 %928 }
 0x182   : > { %v936_v26 = vsel %vm934_vm0, %v929_v22, %v931_v48  ;;  %v937_v27 = vsel %vm934_vm0, %v927_v49, %v929_v22  ;;  %v2507_v49 = vsub.s32 0, %v709_v3 }
 0x183   : > { %v955_v31 = vmul.f32 %v2456_v17, %v937_v27  ;;  %v956_v32 = vmul.f32 %v2461_v18, %v936_v26  ;;  %v2536_v26 = vsub.s32 1, %v709_v3  ;;  %v902_v3 = vsel %vm901_vm2, %v2400_v52, %v2437_v11 }
 0x185   : > { %v975_v40 = vpack.c.bf16 %v955_v31, %v955_v31  ;;  %v976_v41 = vpack.c.bf16 %v956_v32, %v956_v32  ;;  %v2502_v42 = vpop.permute.xlu1 %763  ;;  %v863_v48 = vpop.permute.xlu0 %862  ;;  %v2539_v31 = vrot.slane %v2444_v13, %v875_v24  ;;  %v2545_v32 = vrot.slane %v409_v23, %v2507_v49 }
 0x186   : > { %v870_v9 = vsel %vm868_vm4, %v863_v48, %v2396_v50  ;;  %v871_v15 = vsel %vm868_vm4, %v2398_v51, %v863_v48  ;;  %v2560_v48 = vrot.slane %v409_v23, %v842_v16 }
 0x187   : > { %1972 = vmatprep.subr.msk.bf16.mxu0 %vm989_vm1, %v976_v41  ;;  %v991_v22 = vsel %vm989_vm1, %v975_v40, 0  ;;  %v2548_v41 = vrot.slane %v2482_v28, %v842_v16  ;;  %v890_v2 = vmul.f32 %v2509_v56, %v870_v9  ;;  %v839_v16 = vsel %vm835_vm3, %v834_v21, %v2402_v53 }
 0x188   : > { %1009 = vmatpush1.bf16.msra.mxu0 %v991_v22  ;;  %v889_v22 = vmul.f32 %v2505_v43, %v871_v15  ;;  %v2576_v15 = vrot.slane %v409_v23, %v2536_v26  ;;  %v836_v9 = vsel %vm835_vm3, %v2408_v57, %v834_v21 }
 0x189   : > { %v797_v10 = vpop.permute.xlu1 %796  ;;  %v896_v27 = vpop.permute.xlu0 %895 }
 0x18a   : > { %v903_v40 = vsel %vm901_vm2, %v896_v27, %v2400_v52  ;;  %v904_v24 = vsel %vm901_vm2, %v2404_v54, %v896_v27  ;;  %v905_v52 = vsel %vm901_vm2, %v2437_v11, %v2404_v54  ;;  %v2583_v54 = vrot.slane %v2482_v28, %v2463_v19 }
 0x18b   : > { %v922_v63 = vmul.f32 %v2519_v5, %v904_v24  ;;  %v923_v62 = vmul.f32 %v2521_v6, %v903_v40  ;;  %v924_v11 = vmul.f32 %v2467_v20, %v902_v3  ;;  %v805_v17 = vsel %vm802_vm6, %v2410_v58, %v797_v10 }
 0x18d   : > { %v971_v27 = vpack.c.bf16 %v922_v63, %v889_v22  ;;  %v801_v40 = vpop.permute.xlu1 %800  ;;  %v867_v24 = vpop.permute.xlu0 %866  ;;  %v972_v18 = vpack.c.bf16 %v923_v62, %v890_v2  ;;  %v925_v2 = vmul.f32 %v2473_v25, %v905_v52  ;;  %v859_v62 = vmul.f32 %v2491_v33, %v839_v16 }
 0x18e   : > { %v869_v23 = vsel %vm868_vm4, %v2396_v50, %v867_v24  ;;  %v872_v63 = vsel %vm868_vm4, %v867_v24, %v2398_v51  ;;  %v858_v22 = vmul.f32 %v2486_v30, %v836_v9  ;;  %v772_v50 = vsel %vm769_vm5, %v2406_v55, %v2502_v42 }
 0x18f   : > { %v891_v21 = vmul.f32 %v2539_v31, %v869_v23  ;;  %v892_v3 = vmul.f32 %v2542_v29, %v872_v63  ;;  %1010 = vmatprep.subr.bf16.mxu0 %v972_v18  ;;  %v2606_v51 = vrot.slane %v2449_v14, %v2463_v19  ;;  %v2610_v52 = vrot.slane %v2482_v28, %v2536_v26 }
 0x190   : > { %1011 = vmatpush1.bf16.msra.mxu0 %v971_v27  ;;  %v804_v18 = vsel %vm802_vm6, %v797_v10, %v2414_v60  ;;  %v824_v16 = vmul.f32 %v2512_v0, %v805_v17  ;;  %v806_v19 = vsel %vm802_vm6, %v801_v40, %v2410_v58  ;;  %v2629_v17 = vrot.slane %v2482_v28, %v2507_v49 }
 0x191   : > { %3447 = vst [vmem:[#allocation8_spill] sm:$0xff] %v2610_v52  ;;  %v973_v9 = vpack.c.bf16 %v924_v11, %v891_v21  ;;  %v2616_v24 = vpop.permute.xlu1 %695  ;;  %v830_v23 = vpop.permute.xlu0 %829  ;;  %v974_v63 = vpack.c.bf16 %v925_v2, %v892_v3  ;;  %v791_v10 = vmul.f32 %v2494_v34, %v772_v50  ;;  %v970_v58 = vpack.c.bf16 %v859_v62, %v2268_v38 }
 0x192   : > { %v837_v27 = vsel %vm835_vm3, %v830_v23, %v2408_v57  ;;  %v838_v30 = vsel %vm835_vm3, %v2402_v53, %v830_v23  ;;  %3448 = vst [vmem:[#allocation9_spill] sm:$0xff] %v2629_v17  ;;  %v969_v21 = vpack.c.bf16 %v858_v22, %v2260_v36  ;;  %v771_v53 = vsel %vm769_vm5, %v2502_v42, %v2416_v61 }
 0x193   : > { %v856_v11 = vmul.f32 %v2548_v41, %v838_v30  ;;  %v857_v2 = vmul.f32 %v2560_v48, %v837_v27  ;;  %1051 = vmatprep.subr.bf16.mxu1 %v974_v63  ;;  %v825_v57 = vmul.f32 %v2515_v4, %v804_v18  ;;  %v803_v28 = vsel %vm802_vm6, %v2414_v60, %v801_v40 }
 0x194   : > { %1052 = vmatpush1.bf16.msra.mxu1 %v973_v9  ;;  %v823_v30 = vmul.f32 %v2524_v7, %v806_v19  ;;  %v964_v62 = vpack.c.bf16 %v824_v16, %v791_v10  ;;  %v706_v42 = vsel %vm703_vm7, %v2429_v1, %v2616_v24  ;;  %v792_v9 = vmul.f32 %v2498_v39, %v771_v53 }
 0x195   : > { %v967_v3 = vpack.c.bf16 %v856_v11, %v2258_v35  ;;  %v731_v50 = vpop.permute.xlu1 %730  ;;  %1053 = vmatprep.subr.bf16.mxu1 %v970_v58  ;;  %v768_v38 = vpop.permute.xlu0 %767  ;;  %v968_v36 = vpack.c.bf16 %v857_v2, %v2266_v37  ;;  %v826_v37 = vmul.f32 %v2527_v8, %v803_v28  ;;  %v725_v23 = vmul.f32 %v2545_v32, %v706_v42 }
 0x196   : > { %v739_v60 = vsel %vm736_vm8, %v2439_v12, %v731_v50  ;;  %v770_v40 = vsel %vm769_vm5, %v2416_v61, %v768_v38  ;;  %v773_v35 = vsel %vm769_vm5, %v768_v38, %v2406_v55  ;;  %v2667_v61 = vrot.slane %v2444_v13, %v2536_v26 }
 0x197   : > { %v758_v22 = vmul.f32 %v2576_v15, %v739_v60  ;;  %v790_v18 = vmul.f32 %v2583_v54, %v773_v35  ;;  %v793_v16 = vmul.f32 %v2606_v51, %v770_v40  ;;  %1012 = vmatprep.subr.bf16.mxu0 %v968_v36  ;;  %v2672_v10 = vrot.slane %v2449_v14, %v2536_v26 }
 0x198   : > { %1013 = vmatpush1.bf16.msra.mxu0 %v967_v3  ;;  %1054 = vmatpush1.bf16.msra.mxu1 %v969_v21  ;;  %3449 = vst [vmem:[#allocation10_spill] sm:$0xff] %v2667_v61  ;;  %v965_v11 = vpack.c.bf16 %v825_v57, %v792_v9  ;;  %v2682_v21 = vrot.slane %v2444_v13, %v2507_v49 }
 0x199   : > { %v963_v55 = vpack.c.bf16 %v823_v30, %v790_v18  ;;  %v735_v63 = vpop.permute.xlu1 %734  ;;  %1014 = vmatprep.subr.bf16.mxu0 %v964_v62  ;;  %v700_v19 = vpop.permute.xlu0 %699  ;;  %v966_v27 = vpack.c.bf16 %v826_v37, %v793_v16  ;;  %3450 = vst [vmem:[#allocation11_spill] sm:$0xff] %v2672_v10  ;;  %v960_v26 = vpack.c.bf16 %v758_v22, %v725_v23 }
 0x19a   : > { %v740_v2 = vsel %vm736_vm8, %v735_v63, %v2439_v12  ;;  %v707_v58 = vsel %vm703_vm7, %v700_v19, %v2429_v1  ;;  %3451 = vst [vmem:[#allocation12_spill] sm:$0xff] %v2682_v21  ;;  %v2688_v57 = vrot.slane %v2449_v14, %v2507_v49 }
 0x19b   : > { %v757_v53 = vmul.f32 %v2610_v52, %v740_v2  ;;  %v724_v28 = vmul.f32 %v2629_v17, %v707_v58  ;;  %1055 = vmatprep.subr.bf16.mxu1 %v966_v27  ;;  %v3474_v52 = vld [vmem:[#allocation4_spill] sm:$0xff] }
 0x19c   : > { %3452 = vst [vmem:[#allocation13_spill] sm:$0xff] %v2688_v57  ;;  %1015 = vmatpush1.bf16.msra.mxu0 %v963_v55  ;;  %1056 = vmatpush1.bf16.msra.mxu1 %v965_v11 }
 0x19d   : > { %v959_v12 = vpack.c.bf16 %v757_v53, %v724_v28  ;;  %v733_v30 = vpop.permute.xlu1 %732  ;;  %1016 = vmatprep.subr.bf16.mxu0 %v960_v26  ;;  %v698_v1 = vpop.permute.xlu0 %697 }
 0x19e   : > { %v737_v13 = vsel %vm736_vm8, %v733_v30, %v735_v63  ;;  %v738_v3 = vsel %vm736_vm8, %v731_v50, %v733_v30  ;;  %v704_v38 = vsel %vm703_vm7, %v698_v1, %v700_v19  ;;  %v705_v14 = vsel %vm703_vm7, %v2616_v24, %v698_v1  ;;  %v692_v50 = vld [vmem:[%s3395_s4] sm:$0xf] }
 0x19f   : > { %v759_v49 = vmul.f32 %v2667_v61, %v738_v3  ;;  %v760_v36 = vmul.f32 %v2672_v10, %v737_v13  ;;  %v726_v62 = vmul.f32 %v2682_v21, %v705_v14  ;;  %v727_v42 = vmul.f32 %v2688_v57, %v704_v38  ;;  %v3473_v21 = vld [vmem:[#allocation3_spill] sm:$0xff] }
 0x1a0   : > { %1017 = vmatpush1.bf16.msra.mxu0 %v959_v12  ;;  %v3453_v24 = vmov 0  }
 0x1a1   : > { %v961_v60 = vpack.c.bf16 %v759_v49, %v726_v62  ;;  %v962_v40 = vpack.c.bf16 %v760_v36, %v727_v42  ;;  %v2712_v37 = vpop.permute.xlu1 %1207 }
 0x1a3   : > { %1973 = vmatmul.mubr.msk.bf16.vlgmr.msra.gmra.mxu0 %vm985_vm9, %v692_v50  ;;  %1057 = vmatprep.subr.bf16.mxu1 %v962_v40 }
 0x1a4   : > { %1058 = vmatpush1.bf16.msra.mxu1 %v961_v60  ;;  %1437 = vmatprep.mubr.bf16.mxu0 %v3453_v24 }
 0x1a5   : > { %v1212_v18 = vpop.permute.xlu1 %1211 }
 0x1a7   : > { %1975 = vmatmul.mubr.msk.bf16.vlgmr.msra.gmra.mxu1 %vm985_vm9, %v692_v50 }
 0x1a8   : > { %1478 = vmatprep.mubr.bf16.mxu1 %v3453_v24 }
 0x1a9   : > { %v1178_v55 = vpop.permute.xlu1 %1177 }
 0x1aa   : > { %v2710_v35 = vpop.permute.xlu0 %982 }
 0x1ad   : > { %v1194_v27 = vpop.permute.xlu1 %1193 }
 0x1ae   : > { %v2714_v22 = vpop.permute.xlu0 %1205 }
 0x1af   : > { %v2721_v9 = vsel %vm934_vm0, %v1212_v18, %v2714_v22 }
 0x1b1   : > { %v1190_v58 = vpop.permute.xlu1 %1189 }
 0x1b2   : > { %v2716_v16 = vpop.permute.xlu0 %1209 }
 0x1b3   : > { %v2726_v23 = vsel %vm934_vm0, %v2716_v16, %v1212_v18 }
 0x1b4   : > { %3454 = vst [vmem:[#allocation14_spill] sm:$0xff] %v2726_v23 }
 0x1b5   : > { %v1196_v13 = vpop.permute.xlu1 %1195 }
 0x1b6   : > { %v1176_v63 = vpop.permute.xlu0 %1175  ;;  %v1197_v38 = vsel %vm901_vm2, %v1194_v27, %v1196_v13  ;;  %v1200_v14 = vsel %vm901_vm2, %v1196_v13, %v1190_v58 }
 0x1b7   : > { %v1182_v19 = vsel %vm868_vm4, %v1176_v63, %v1178_v55  ;;  %v2753_v62 = vmul.f32 %v1197_v38, %v2467_v20 }
 0x1b8   : > { %v2759_v50 = vmul.f32 %v1182_v19, %v2509_v56 }
 0x1b9   : > { %3457 = vst [vmem:[#allocation17_spill] sm:$0xff] %v2753_v62 }
 0x1ba   : > { %v1192_v11 = vpop.permute.xlu0 %1191  ;;  %3459 = vst [vmem:[#allocation19_spill] sm:$0xff] %v2759_v50  ;;  %v3472_v50 = vld [vmem:[#allocation6_spill] sm:$0xff] }
 0x1bb   : > { %v1198_v2 = vsel %vm901_vm2, %v1192_v11, %v1194_v27  ;;  %v1199_v28 = vsel %vm901_vm2, %v1190_v58, %v1192_v11  ;;  %v2773_v11 = vmul.f32 %v1200_v14, %v2473_v25 }
 0x1bc   : > { %v2737_v12 = vmul.f32 %v1199_v28, %v2519_v5  ;;  %v2762_v60 = vmul.f32 %v1198_v2, %v2521_v6 }
 0x1bd   : > { %3462 = vst [vmem:[#allocation22_spill] sm:$0xff] %v2773_v11 }
 0x1be   : > { %v1174_v53 = vpop.permute.xlu0 %1173  ;;  %3455 = vst [vmem:[#allocation15_spill] sm:$0xff] %v2737_v12  ;;  %3460 = vst [vmem:[#allocation20_spill] sm:$0xff] %v2762_v60 }
 0x1bf   : > { %v1183_v26 = vsel %vm868_vm4, %v1174_v53, %v1176_v63 }
 0x1c0   : > { %v2740_v30 = vmul.f32 %v1183_v26, %v2505_v43 }
 0x1c2   : > { %3456 = vst [vmem:[#allocation16_spill] sm:$0xff] %v2740_v30  ;;  %v1180_v3 = vpop.permute.xlu0 %1179 }
 0x1c3   : > { %v1181_v49 = vsel %vm868_vm4, %v1178_v55, %v1180_v3  ;;  %v1184_v36 = vsel %vm868_vm4, %v1180_v3, %v1174_v53  ;;  %v1162_v55 = vpop.permute.xlu1 %1161 }
 0x1c4   : > { %v2756_v42 = vmul.f32 %v1181_v49, %v2539_v31  ;;  %v2776_v19 = vmul.f32 %v1184_v36, %v2542_v29 }
 0x1c6   : > { %3458 = vst [vmem:[#allocation18_spill] sm:$0xff] %v2756_v42  ;;  %v1160_v63 = vpop.permute.xlu0 %1159  ;;  %3463 = vst [vmem:[#allocation23_spill] sm:$0xff] %v2776_v19 }
 0x1c7   : > { %v2770_v27 = vsel %vm835_vm3, %v1160_v63, %v1162_v55  ;;  %v1164_v2 = vpop.permute.xlu1 %1163 }
 0x1c8   : > { %3461 = vst [vmem:[#allocation21_spill] sm:$0xff] %v2770_v27  ;;  %v2780_v53 = vsel %vm835_vm3, %v1162_v55, %v1164_v2 }
 0x1c9   : > { %3464 = vst [vmem:[#allocation24_spill] sm:$0xff] %v2780_v53 }
 0x1ca   : > { %v1158_v58 = vpop.permute.xlu0 %1157 }
 0x1cb   : > { %v2784_v28 = vsel %vm835_vm3, %v1158_v58, %v1160_v63  ;;  %v2788_v26 = vsel %vm835_vm3, %v1164_v2, %v1158_v58 }
 0x1cc   : > { %3465 = vst [vmem:[#allocation25_spill] sm:$0xff] %v2784_v28  ;;  %3466 = vst [vmem:[#allocation26_spill] sm:$0xff] %v2788_v26  ;;  %v3471_v28 = vld [vmem:[#allocation5_spill] sm:$0xff] }
 0x263   : > { %v1036_v3 = vpop.f32.mrf.mxu0 }
 0x264   : > { %v1037_v38 = vadd.f32 %v1036_v3, %v2710_v35 }
 0x265   : > { %v1038_v14 = vpop.f32.mrf.mxu0 }
 0x266   : > { %v2793_v49 = vmax.f32 %v1037_v38, 0.0 }
 0x267   : > { %v1040_v36 = vpop.f32.mrf.mxu0  ;;  %v1077_v55 = vpop.f32.mrf.mxu1 }
 0x268   : > { %v1078_v40 = vadd.f32 %v1077_v55, %v2710_v35  ;;  %1354 = vrot.lane.b32.xlu1 %v2793_v49, %s2073_s20 }
 0x269   : > { %v1041_v63 = vpop.f32.mrf.mxu0  ;;  %v1079_v1 = vpop.f32.mrf.mxu1 }
 0x26a   : > { %v2798_v2 = vmax.f32 %v1078_v40, 0.0  ;;  %v1039_v40 = vadd.f32 %v1038_v14, %v2710_v35  ;;  %v1080_v36 = vadd.f32 %v1079_v1, %v2710_v35  ;;  %v1584_v35 = vld [vmem:[%s3399_s8] sm:$0xff]  ;;  %v2897_v1 = vpop.permute.xlu0 %1125 }
 0x26b   : > { %v1081_v58 = vpop.f32.mrf.mxu1  ;;  %3468 = vst [vmem:[#allocation28_spill] sm:$0xff] %v2897_v1 }
 0x26c   : > { %1358 = vrot.lane.b32.xlu0 %v2798_v2, %s2073_s20  ;;  %1326 = vrot.lane.b32.xlu1 %v2798_v2, %s2074_s21  ;;  %v2825_v38 = vmax.f32 %v1039_v40, 0.0  ;;  %v2832_v55 = vmax.f32 %v1080_v36, 0.0 }
 0x26d   : > { %v1082_v3 = vpop.f32.mrf.mxu1 }
 0x26e   : > { %v2901_v63 = vpop.permute.xlu0 %1141 }
 0x26f   : > { %3470 = vst [vmem:[#allocation30_spill] sm:$0xff] %v2901_v63 }
 0x270   : > { %1322 = vrot.lane.b32.xlu0 %v2793_v49, %s2074_s21  ;;  %1342 = vrot.lane.b32.xlu1 %v2798_v2, %s2075_s22 }
 0x274   : > { %1306 = vrot.lane.b32.xlu0 %v2793_v49, %s2076_s23  ;;  %1338 = vrot.lane.b32.xlu1 %v2793_v49, %s2075_s22 }
 0x278   : > { %1274 = vrot.lane.b32.xlu0 %v2793_v49, %s2077_s24  ;;  %1310 = vrot.lane.b32.xlu1 %v2798_v2, %s2076_s23 }
 0x27c   : > { %1290 = vrot.lane.b32.xlu0 %v2793_v49, %s2078_s25  ;;  %1294 = vrot.lane.b32.xlu1 %v2798_v2, %s2078_s25 }
 0x280   : > { %1278 = vrot.lane.b32.xlu0 %v2798_v2, %s2077_s24  ;;  %1262 = vrot.lane.b32.xlu1 %v2798_v2, %s2080_s27 }
 0x284   : > { %1242 = vrot.lane.b32.xlu0 %v2793_v49, %s2079_s26  ;;  %1356 = vrot.lane.b32.xlu1 %v2825_v38, %s2073_s20 }
 0x288   : > { %1258 = vrot.lane.b32.xlu0 %v2793_v49, %s2080_s27  ;;  %1360 = vrot.lane.b32.xlu1 %v2832_v55, %s2073_s20 }
 0x28c   : > { %1246 = vrot.lane.b32.xlu0 %v2798_v2, %s2079_s26  ;;  %1344 = vrot.lane.b32.xlu1 %v2832_v55, %s2075_s22 }
 0x290   : > { %1324 = vrot.lane.b32.xlu0 %v2825_v38, %s2074_s21  ;;  %1312 = vrot.lane.b32.xlu1 %v2832_v55, %s2076_s23 }
 0x294   : > { %1340 = vrot.lane.b32.xlu0 %v2825_v38, %s2075_s22  ;;  %1276 = vrot.lane.b32.xlu1 %v2825_v38, %s2077_s24 }
 0x298   : > { %1328 = vrot.lane.b32.xlu0 %v2832_v55, %s2074_s21  ;;  %1292 = vrot.lane.b32.xlu1 %v2825_v38, %s2078_s25 }
 0x29c   : > { %1308 = vrot.lane.b32.xlu0 %v2825_v38, %s2076_s23  ;;  %1296 = vrot.lane.b32.xlu1 %v2832_v55, %s2078_s25 }
 0x2a0   : > { %1280 = vrot.lane.b32.xlu0 %v2832_v55, %s2077_s24  ;;  %1244 = vrot.lane.b32.xlu1 %v2825_v38, %s2079_s26 }
 0x2a4   : > { %1248 = vrot.lane.b32.xlu0 %v2832_v55, %s2079_s26  ;;  %1260 = vrot.lane.b32.xlu1 %v2825_v38, %s2080_s27 }
 0x2a8   : > { %1131 = vrot.lane.b32.xlu0 %v2353_v46, %s2077_s24  ;;  %1264 = vrot.lane.b32.xlu1 %v2832_v55, %s2080_s27 }
 0x2ac   : > { %1129 = vrot.lane.b32.xlu0 %v2360_v47, %s2077_s24  ;;  %1147 = vrot.lane.b32.xlu1 %v2353_v46, %s2078_s25 }
 0x2b0   : > { %1093 = vrot.lane.b32.xlu0 %v2350_v45, %s2079_s26  ;;  %1145 = vrot.lane.b32.xlu1 %v2360_v47, %s2078_s25 }
 0x2b4   : > { %1109 = vrot.lane.b32.xlu0 %v2350_v45, %s2080_s27  ;;  %1095 = vrot.lane.b32.xlu1 %v2345_v44, %s2079_s26  ;;  %v2895_v45 = vpop.permute.xlu1 %1127 }
 0x2b5   : > { %3467 = vst [vmem:[#allocation27_spill] sm:$0xff] %v2895_v45 }
 0x2b8   : > { %1099 = vrot.lane.b32.xlu0 %v2353_v46, %s2079_s26  ;;  %1111 = vrot.lane.b32.xlu1 %v2345_v44, %s2080_s27  ;;  %v2899_v14 = vpop.permute.xlu1 %1143 }
 0x2b9   : > { %3469 = vst [vmem:[#allocation29_spill] sm:$0xff] %v2899_v14 }
 0x2bc   : > { %1097 = vrot.lane.b32.xlu0 %v2360_v47, %s2079_s26  ;;  %1115 = vrot.lane.b32.xlu1 %v2353_v46, %s2080_s27 }
 0x2c0   : > { %1587 = vperm.xlu0 %2007, %v1584_v35   ;;  %1113 = vrot.lane.b32.xlu1 %v2360_v47, %s2080_s27 }
 0x2da   : > { %v1355_v58 = vpop.permute.xlu1 %1354 }
 0x2de   : > { %v1359_v3 = vpop.permute.xlu0 %1358  ;;  %v1327_v40 = vpop.permute.xlu1 %1326 }
 0x2e2   : > { %v1323_v46 = vpop.permute.xlu0 %1322  ;;  %v1343_v36 = vpop.permute.xlu1 %1342 }
 0x2e6   : > { %v2903_v13 = vpop.permute.xlu0 %1306  ;;  %v1339_v18 = vpop.permute.xlu1 %1338 }
 0x2ea   : > { %v2905_v35 = vpop.permute.xlu0 %1274  ;;  %v2907_v42 = vpop.permute.xlu1 %1310 }
 0x2ee   : > { %v2909_v47 = vpop.permute.xlu0 %1290  ;;  %v2911_v62 = vpop.permute.xlu1 %1294 }
 0x2f2   : > { %v2913_v30 = vpop.permute.xlu0 %1278  ;;  %v2915_v12 = vpop.permute.xlu1 %1262 }
 0x2f6   : > { %v2917_v44 = vpop.permute.xlu0 %1242  ;;  %v1357_v24 = vpop.permute.xlu1 %1356 }
 0x2f7   : > { %v1363_v19 = vsel %vm934_vm0, %v1357_v24, %v1359_v3  ;;  %v1364_v11 = vsel %vm934_vm0, %v1355_v58, %v1357_v24 }
 0x2f8   : > { %v1366_v53 = vmul.f32 %v3471_v28, %v1364_v11  ;;  %v1367_v60 = vmul.f32 %v3472_v50, %v1363_v19 }
 0x2fa   : > { %v1386_v63 = vpack.c.bf16 %v1366_v53, %v1366_v53  ;;  %v1387_v14 = vpack.c.bf16 %v1367_v60, %v1367_v60  ;;  %v2925_v26 = vpop.permute.xlu0 %1258  ;;  %v1361_v1 = vpop.permute.xlu1 %1360 }
 0x2fb   : > { %v1362_v45 = vsel %vm934_vm0, %v1359_v3, %v1361_v1  ;;  %v1365_v27 = vsel %vm934_vm0, %v1361_v1, %v1355_v58 }
 0x2fc   : > { %v1368_v10 = vmul.f32 %v3473_v21, %v1362_v45  ;;  %v1369_v57 = vmul.f32 %v3474_v52, %v1365_v27  ;;  %1976 = vmatprep.subr.msk.bf16.mxu0 %vm989_vm1, %v1387_v14  ;;  %v1394_v24 = vsel %vm989_vm1, %v1386_v63, 0 }
 0x2fd   : > { %1412 = vmatpush1.bf16.msra.mxu0 %v1394_v24 }
 0x2fe   : > { %v1388_v11 = vpack.c.bf16 %v1368_v10, %v1368_v10  ;;  %v1389_v60 = vpack.c.bf16 %v1369_v57, %v1369_v57  ;;  %v2935_v19 = vpop.permute.xlu0 %1246  ;;  %v1345_v53 = vpop.permute.xlu1 %1344 }
 0x2ff   : > { %v1346_v10 = vsel %vm901_vm2, %v1343_v36, %v1345_v53  ;;  %v1349_v57 = vsel %vm901_vm2, %v1345_v53, %v1339_v18 }
 0x300   : > { %1978 = vmatprep.subr.msk.bf16.mxu1 %vm989_vm1, %v1389_v60  ;;  %v1400_v3 = vsel %vm989_vm1, %v1388_v11, 0  ;;  %v1352_v53 = vmul.f32 %v1346_v10, %v2467_v20 }
 0x301   : > { %1453 = vmatpush1.bf16.msra.mxu1 %v1400_v3 }
 0x302   : > { %v1325_v1 = vpop.permute.xlu0 %1324  ;;  %v1313_v58 = vpop.permute.xlu1 %1312 }
 0x303   : > { %v1331_v27 = vsel %vm868_vm4, %v1325_v1, %v1327_v40  ;;  %v1332_v45 = vsel %vm868_vm4, %v1323_v46, %v1325_v1  ;;  %v1317_v61 = vsel %vm835_vm3, %v1313_v58, %v2903_v13 }
 0x304   : > { %v1334_v60 = vmul.f32 %v1332_v45, %v2505_v43  ;;  %v1335_v3 = vmul.f32 %v1331_v27, %v2509_v56  ;;  %v1314_v27 = vsel %vm835_vm3, %v2907_v42, %v1313_v58 }
 0x306   : > { %v1341_v14 = vpop.permute.xlu0 %1340  ;;  %v1277_v63 = vpop.permute.xlu1 %1276 }
 0x307   : > { %v1347_v24 = vsel %vm901_vm2, %v1341_v14, %v1343_v36  ;;  %v1348_v11 = vsel %vm901_vm2, %v1339_v18, %v1341_v14  ;;  %v1353_v18 = vmul.f32 %v1349_v57, %v2473_v25  ;;  %v3475_v57 = vld [vmem:[#allocation7_spill] sm:$0xff] }
 0x308   : > { %v1350_v1 = vmul.f32 %v1348_v11, %v2519_v5  ;;  %v1351_v17 = vmul.f32 %v1347_v24, %v2521_v6  ;;  %v1321_v24 = vmul.f32 %v1317_v61, %v2491_v33  ;;  %v1320_v58 = vmul.f32 %v1314_v27, %v3475_v57 }
 0x30a   : > { %v1382_v21 = vpack.c.bf16 %v1350_v1, %v1334_v60  ;;  %v1329_v23 = vpop.permute.xlu0 %1328  ;;  %v1293_v36 = vpop.permute.xlu1 %1292  ;;  %v1383_v50 = vpack.c.bf16 %v1351_v17, %v1335_v3 }
 0x30b   : > { %v1330_v45 = vsel %vm868_vm4, %v1327_v40, %v1329_v23  ;;  %v1333_v14 = vsel %vm868_vm4, %v1329_v23, %v1323_v46  ;;  %v1300_v17 = vsel %vm802_vm6, %v2909_v47, %v1293_v36  ;;  %v1284_v40 = vsel %vm769_vm5, %v2905_v35, %v1277_v63 }
 0x30c   : > { %v1336_v10 = vmul.f32 %v1330_v45, %v2539_v31  ;;  %v1337_v11 = vmul.f32 %v1333_v14, %v2542_v29  ;;  %1413 = vmatprep.subr.bf16.mxu0 %v1383_v50  ;;  %v1303_v3 = vmul.f32 %v1300_v17, %v2512_v0  ;;  %v1299_v50 = vsel %vm802_vm6, %v1293_v36, %v2911_v62 }
 0x30d   : > { %1414 = vmatpush1.bf16.msra.mxu0 %v1382_v21  ;;  %v1287_v45 = vmul.f32 %v1284_v40, %v2494_v34  ;;  %v1380_v36 = vpack.c.bf16 %v1320_v58, %v2798_v2  ;;  %v1283_v14 = vsel %vm769_vm5, %v1277_v63, %v2913_v30 }
 0x30e   : > { %v1384_v60 = vpack.c.bf16 %v1352_v53, %v1336_v10  ;;  %v1309_v23 = vpop.permute.xlu0 %1308  ;;  %v1297_v46 = vpop.permute.xlu1 %1296  ;;  %v1385_v61 = vpack.c.bf16 %v1353_v18, %v1337_v11  ;;  %v1381_v18 = vpack.c.bf16 %v1321_v24, %v2832_v55 }
 0x30f   : > { %v1315_v1 = vsel %vm835_vm3, %v1309_v23, %v2907_v42  ;;  %v1316_v21 = vsel %vm835_vm3, %v2903_v13, %v1309_v23  ;;  %v1298_v42 = vsel %vm802_vm6, %v2911_v62, %v1297_v46  ;;  %v1301_v13 = vsel %vm802_vm6, %v1297_v46, %v2909_v47 }
 0x310   : > { %v1318_v27 = vmul.f32 %v1316_v21, %v2548_v41  ;;  %v1319_v53 = vmul.f32 %v1315_v1, %v2560_v48  ;;  %1454 = vmatprep.subr.bf16.mxu1 %v1385_v61  ;;  %v1304_v62 = vmul.f32 %v1299_v50, %v2515_v4  ;;  %v1375_v17 = vpack.c.bf16 %v1303_v3, %v1287_v45  ;;  %v3476_v45 = vld [vmem:[#allocation6_spill] sm:$0xff] }
 0x311   : > { %1455 = vmatpush1.bf16.msra.mxu1 %v1384_v60  ;;  %v1302_v63 = vmul.f32 %v1301_v13, %v2524_v7  ;;  %v1214_v3 = vsel %vm934_vm0, %v2712_v37, %v2716_v16 }
 0x312   : > { %v1378_v10 = vpack.c.bf16 %v1318_v27, %v2793_v49  ;;  %v1281_v55 = vpop.permute.xlu0 %1280  ;;  %1456 = vmatprep.subr.bf16.mxu1 %v1381_v18  ;;  %v1245_v24 = vpop.permute.xlu1 %1244  ;;  %v1379_v11 = vpack.c.bf16 %v1319_v53, %v2825_v38  ;;  %v1305_v49 = vmul.f32 %v1298_v42, %v2527_v8  ;;  %v1288_v38 = vmul.f32 %v1283_v14, %v2498_v39 }
 0x313   : > { %v1282_v47 = vsel %vm769_vm5, %v2913_v30, %v1281_v55  ;;  %v1285_v2 = vsel %vm769_vm5, %v1281_v55, %v2905_v35  ;;  %v1252_v30 = vsel %vm703_vm7, %v2917_v44, %v1245_v24  ;;  %v1215_v35 = vsel %vm934_vm0, %v2714_v22, %v2712_v37  ;;  %v3478_v55 = vld [vmem:[#allocation3_spill] sm:$0xff] }
 0x314   : > { %v1286_v58 = vmul.f32 %v1285_v2, %v2583_v54  ;;  %v1289_v40 = vmul.f32 %v1282_v47, %v2606_v51  ;;  %1415 = vmatprep.subr.bf16.mxu0 %v1379_v11  ;;  %v1376_v1 = vpack.c.bf16 %v1304_v62, %v1288_v38  ;;  %v1255_v50 = vmul.f32 %v1252_v30, %v2545_v32  ;;  %v3479_v62 = vld [vmem:[#allocation10_spill] sm:$0xff] }
 0x315   : > { %1416 = vmatpush1.bf16.msra.mxu0 %v1378_v10  ;;  %1457 = vmatpush1.bf16.msra.mxu1 %v1380_v36  ;;  %v1217_v53 = vmul.f32 %v3471_v28, %v1215_v35  ;;  %v1220_v18 = vmul.f32 %v3474_v52, %v2721_v9  ;;  %v1218_v42 = vmul.f32 %v3476_v45, %v1214_v3  ;;  %v3477_v10 = vld [vmem:[#allocation14_spill] sm:$0xff]  ;;  %v3480_v9 = vld [vmem:[#allocation9_spill] sm:$0xff] }
 0x316   : > { %v1374_v60 = vpack.c.bf16 %v1302_v63, %v1286_v58  ;;  %v1249_v23 = vpop.permute.xlu0 %1248  ;;  %1417 = vmatprep.subr.bf16.mxu0 %v1375_v17  ;;  %v1261_v46 = vpop.permute.xlu1 %1260  ;;  %v1377_v61 = vpack.c.bf16 %v1305_v49, %v1289_v40  ;;  %v1251_v13 = vsel %vm703_vm7, %v1245_v24, %v2935_v19  ;;  %v1219_v11 = vmul.f32 %v3478_v55, %v3477_v10  ;;  %v3481_v17 = vld [vmem:[#allocation13_spill] sm:$0xff]  ;;  %v3482_v24 = vld [vmem:[#allocation8_spill] sm:$0xff]  ;;  %v3483_v49 = vld [vmem:[#allocation11_spill] sm:$0xff] }
 0x317   : > { %v1268_v21 = vsel %vm736_vm8, %v2925_v26, %v1261_v46  ;;  %v1267_v22 = vsel %vm736_vm8, %v1261_v46, %v2915_v12  ;;  %v1250_v37 = vsel %vm703_vm7, %v2935_v19, %v1249_v23  ;;  %v1253_v16 = vsel %vm703_vm7, %v1249_v23, %v2917_v44  ;;  %v3484_v40 = vld [vmem:[#allocation12_spill] sm:$0xff]  ;;  %v3488_v45 = vld [vmem:[#allocation26_spill] sm:$0xff] }
 0x318   : > { %v1271_v27 = vmul.f32 %v1268_v21, %v2576_v15  ;;  %1458 = vmatprep.subr.bf16.mxu1 %v1377_v61  ;;  %v1272_v47 = vmul.f32 %v1267_v22, %v3479_v62  ;;  %v1254_v2 = vmul.f32 %v1253_v16, %v3480_v9  ;;  %v1257_v19 = vmul.f32 %v1250_v37, %v3481_v17  ;;  %v3485_v22 = vld [vmem:[#allocation21_spill] sm:$0xff]  ;;  %v3487_v37 = vld [vmem:[#allocation28_spill] sm:$0xff] }
 0x319   : > { %1418 = vmatpush1.bf16.msra.mxu0 %v1374_v60  ;;  %1459 = vmatpush1.bf16.msra.mxu1 %v1376_v1  ;;  %v1256_v38 = vmul.f32 %v1251_v13, %v3484_v40  ;;  %v1238_v46 = vpack.c.bf16 %v1218_v42, %v1218_v42  ;;  %v1240_v3 = vpack.c.bf16 %v1220_v18, %v1220_v18  ;;  %v1241_v1 = vld [vmem:[%s3398_s7] sm:$0xf]  ;;  %v3489_v13 = vld [vmem:[#allocation29_spill] sm:$0xff] }
 0x31a   : > { %v1132_v28 = vpop.permute.xlu0 %1131  ;;  %v1265_v36 = vpop.permute.xlu1 %1264  ;;  %v1371_v14 = vpack.c.bf16 %v1271_v27, %v1255_v50  ;;  %v1170_v27 = vmul.f32 %v3485_v22, %v2560_v48  ;;  %v1172_v42 = vmul.f32 %v3488_v45, %v2491_v33  ;;  %v3500_v22 = vld [vmem:[#allocation2_spill] sm:$0xff] }
 0x31b   : > { %v1266_v44 = vsel %vm736_vm8, %v2915_v12, %v1265_v36  ;;  %v1269_v52 = vsel %vm736_vm8, %v1265_v36, %v2925_v26  ;;  %v1237_v12 = vpack.c.bf16 %v1217_v53, %v1217_v53  ;;  %v1372_v61 = vpack.c.bf16 %v1272_v47, %v1256_v38  ;;  %v3486_v53 = vld [vmem:[#allocation27_spill] sm:$0xff]  ;;  %v3490_v36 = vld [vmem:[#allocation30_spill] sm:$0xff] }
 0x31c   : > { %v1270_v63 = vmul.f32 %v1269_v52, %v3482_v24  ;;  %v1273_v58 = vmul.f32 %v1266_v44, %v3483_v49  ;;  %1419 = vmatprep.subr.bf16.mxu0 %v1371_v14  ;;  %v1239_v26 = vpack.c.bf16 %v1219_v11, %v1219_v11  ;;  %v1135_v16 = vsel %vm769_vm5, %v3487_v37, %v3486_v53  ;;  %v3491_v11 = vld [vmem:[#allocation20_spill] sm:$0xff]  ;;  %v3492_v47 = vld [vmem:[#allocation19_spill] sm:$0xff] }
 0x31d   : > { %v1491_v18 = vsel %vm989_vm1, %v1237_v12, 0  ;;  %v1151_v14 = vsel %vm802_vm6, %v3490_v36, %v3489_v13  ;;  %v3493_v44 = vpack.c.bf16 %v3491_v11, %v3492_v47  ;;  %v3494_v52 = vld [vmem:[#allocation24_spill] sm:$0xff]  ;;  %v2057_v47 = vld [vmem:[%s2342_s18 + $0x18] sm:$0xff] }
 0x31e   : > { %v1370_v30 = vpack.c.bf16 %v1270_v63, %v1254_v2  ;;  %v1130_v35 = vpop.permute.xlu0 %1129  ;;  %v1148_v60 = vpop.permute.xlu1 %1147  ;;  %v1373_v23 = vpack.c.bf16 %v1273_v58, %v1257_v19  ;;  %v1497_v10 = vsel %vm989_vm1, %v1239_v26, 0  ;;  %v1171_v2 = vmul.f32 %v3494_v52, %v3475_v57  ;;  %v3495_v19 = vld [vmem:[#allocation25_spill] sm:$0xff]  ;;  %v3502_v11 = vld [vmem:[#allocation16_spill] sm:$0xff]  ;;  %v3505_v52 = vld [vmem:[#allocation18_spill] sm:$0xff] }
 0x31f   : > { %v1169_v63 = vmul.f32 %v3495_v19, %v2548_v41  ;;  %v1138_v58 = vmul.f32 %v1135_v16, %v2494_v34  ;;  %v1133_v26 = vsel %vm769_vm5, %v1130_v35, %v1132_v28  ;;  %v1230_v16 = vpack.c.bf16 %v1170_v27, %v3500_v22 }
 0x320   : > { %1420 = vmatpush1.bf16.msra.mxu0 %v1370_v30  ;;  %1460 = vmatprep.subr.bf16.mxu1 %v1373_v23  ;;  %v3496_v30 = vld [vmem:[#allocation22_spill] sm:$0xff]  ;;  %v3497_v23 = vld [vmem:[#allocation23_spill] sm:$0xff]  ;;  %v1134_v19 = vsel %vm769_vm5, %v3486_v53, %v1130_v35 }
 0x321   : > { %1461 = vmatpush1.bf16.msra.mxu1 %v1372_v61  ;;  %1980 = vmatprep.subr.msk.bf16.mxu0 %vm989_vm1, %v1238_v46  ;;  %v3498_v12 = vpack.c.bf16 %v3496_v30, %v3497_v23  ;;  %v3499_v61 = vmov 0  }
 0x322   : > { %v1094_v21 = vpop.permute.xlu0 %1093  ;;  %1982 = vmatprep.subr.msk.bf16.mxu1 %vm989_vm1, %v1240_v3  ;;  %v1146_v50 = vpop.permute.xlu1 %1145  ;;  %v1154_v3 = vmul.f32 %v1151_v14, %v2512_v0 }
 0x323   : > { %1977 = vmatmul.mubr.msk.bf16.vlgmr.msra.gmra.mxu0 %vm985_vm9, %v1241_v1  ;;  %v1149_v55 = vsel %vm802_vm6, %v1146_v50, %v1148_v60 }
 0x324   : > { %1979 = vmatmul.mubr.msk.bf16.vlgmr.msra.gmra.mxu1 %vm985_vm9, %v1241_v1  ;;  %1509 = vmatpush1.bf16.msra.mxu0 %v1491_v18  ;;  %v1152_v1 = vsel %vm802_vm6, %v1148_v60, %v3490_v36  ;;  %v1150_v18 = vsel %vm802_vm6, %v3489_v13, %v1146_v50  ;;  %v1156_v45 = vmul.f32 %v1149_v55, %v2527_v8  ;;  %v3504_v36 = vld [vmem:[#allocation17_spill] sm:$0xff]  ;;  %v2058_v13 = vld [vmem:[%s2342_s18] sm:$0xff] }
 0x325   : > { %1510 = vmatprep.subr.bf16.mxu0 %v3493_v44  ;;  %1550 = vmatpush1.bf16.msra.mxu1 %v1497_v10  ;;  %v3501_v10 = vld [vmem:[#allocation15_spill] sm:$0xff]  ;;  %v1232_v44 = vpack.c.bf16 %v1172_v42, %v2057_v47  ;;  %v1136_v60 = vsel %vm769_vm5, %v1132_v28, %v3487_v37  ;;  %v3506_v50 = vpack.c.bf16 %v3504_v36, %v3505_v52  ;;  %v2059_v37 = vld [vmem:[%s2342_s18 + $0x10] sm:$0xff]  ;;  %s405_s18 = scalar_lea.vmem %s3402_s11, %s1933_s12 }
 0x326   : > { %v1110_v38 = vpop.permute.xlu0 %1109  ;;  %1551 = vmatprep.subr.bf16.mxu1 %v3498_v12  ;;  %v1096_v46 = vpop.permute.xlu1 %1095  ;;  %1534 = vmatprep.mubr.bf16.mxu0 %v3499_v61  ;;  %v3503_v14 = vpack.c.bf16 %v3501_v10, %v3502_v11  ;;  %v1229_v55 = vpack.c.bf16 %v1169_v63, %v2058_v13  ;;  %v1140_v42 = vmul.f32 %v1133_v26, %v2606_v51 }
 0x327   : > { %1575 = vmatprep.mubr.bf16.mxu1 %v3499_v61  ;;  %v1103_v27 = vsel %vm703_vm7, %v1094_v21, %v1096_v46  ;;  %v1153_v30 = vmul.f32 %v1152_v1, %v2524_v7  ;;  %v1231_v12 = vpack.c.bf16 %v1171_v2, %v2059_v37  ;;  %v1155_v22 = vmul.f32 %v1150_v18, %v2515_v4 }
 0x328   : > { %1511 = vmatpush1.bf16.msra.mxu0 %v3503_v14  ;;  %v1226_v10 = vpack.c.bf16 %v1154_v3, %v1138_v58  ;;  %v1137_v63 = vmul.f32 %v1136_v60, %v2583_v54  ;;  %v1106_v11 = vmul.f32 %v1103_v27, %v2545_v32  ;;  %v1228_v53 = vpack.c.bf16 %v1156_v45, %v1140_v42 }
 0x329   : > { %1512 = vmatprep.subr.bf16.mxu0 %v1230_v16  ;;  %1552 = vmatpush1.bf16.msra.mxu1 %v3506_v50  ;;  %v1139_v26 = vmul.f32 %v1134_v19, %v2498_v39 }
 0x32a   : > { %v1100_v23 = vpop.permute.xlu0 %1099  ;;  %1553 = vmatprep.subr.bf16.mxu1 %v1232_v44  ;;  %v1112_v28 = vpop.permute.xlu1 %1111  ;;  %v1225_v2 = vpack.c.bf16 %v1153_v30, %v1137_v63 }
 0x32b   : > { %v1119_v16 = vsel %vm736_vm8, %v1110_v38, %v1112_v28  ;;  %v1104_v1 = vsel %vm703_vm7, %v1100_v23, %v1094_v21  ;;  %v1227_v3 = vpack.c.bf16 %v1155_v22, %v1139_v26 }
 0x32c   : > { %v1122_v35 = vmul.f32 %v1119_v16, %v2576_v15  ;;  %1513 = vmatpush1.bf16.msra.mxu0 %v1229_v55  ;;  %v1105_v44 = vmul.f32 %v1104_v1, %v3480_v9 }
 0x32d   : > { %1514 = vmatprep.subr.bf16.mxu0 %v1226_v10  ;;  %1554 = vmatpush1.bf16.msra.mxu1 %v1231_v12 }
 0x32e   : > { %v1098_v18 = vpop.permute.xlu0 %1097  ;;  %1555 = vmatprep.subr.bf16.mxu1 %v1228_v53  ;;  %v1116_v14 = vpop.permute.xlu1 %1115  ;;  %v1222_v58 = vpack.c.bf16 %v1122_v35, %v1106_v11 }
 0x32f   : > { %v1120_v47 = vsel %vm736_vm8, %v1116_v14, %v1110_v38  ;;  %v1101_v60 = vsel %vm703_vm7, %v1098_v18, %v1100_v23  ;;  %v1102_v21 = vsel %vm703_vm7, %v1096_v46, %v1098_v18  ;;  %v1088_v46 = vld [vmem:[%s3397_s6] sm:$0xf] }
 0x330   : > { %v1121_v45 = vmul.f32 %v1120_v47, %v3482_v24  ;;  %1515 = vmatpush1.bf16.msra.mxu0 %v1225_v2  ;;  %v1107_v50 = vmul.f32 %v1102_v21, %v3484_v40  ;;  %v1108_v13 = vmul.f32 %v1101_v60, %v3481_v17 }
 0x331   : > { %1516 = vmatprep.subr.bf16.mxu0 %v1222_v58  ;;  %1556 = vmatpush1.bf16.msra.mxu1 %v1227_v3 }
 0x332   : > { %v1221_v27 = vpack.c.bf16 %v1121_v45, %v1105_v44  ;;  %v1114_v36 = vpop.permute.xlu1 %1113 }
 0x333   : > { %v1117_v52 = vsel %vm736_vm8, %v1114_v36, %v1116_v14  ;;  %v1118_v38 = vsel %vm736_vm8, %v1112_v28, %v1114_v36 }
 0x334   : > { %v1123_v55 = vmul.f32 %v1118_v38, %v3479_v62  ;;  %v1124_v19 = vmul.f32 %v1117_v52, %v3483_v49  ;;  %1517 = vmatpush1.bf16.msra.mxu0 %v1221_v27 }
 0x336   : > { %v1223_v42 = vpack.c.bf16 %v1123_v55, %v1107_v50  ;;  %v1224_v30 = vpack.c.bf16 %v1124_v19, %v1108_v13  ;;  %v1747_v13 = vld [vmem:[%s3401_s10] sm:$0xff] }
 0x337   : > { %1981 = vmatmul.mubr.msk.bf16.vlgmr.msra.gmra.mxu0 %vm985_vm9, %v1088_v46 }
 0x338   : > { %1557 = vmatprep.subr.bf16.mxu1 %v1224_v30  ;;  %1800 = vmatprep.mubr.bf16.mxu0 %v3499_v61 }
 0x339   : > { %1558 = vmatpush1.bf16.msra.mxu1 %v1223_v42 }
 0x33b   : > { %v1588_v53 = vpop.permute.xlu0 %1587 }
 0x33c   : > { %1983 = vmatmul.mubr.msk.bf16.vlgmr.msra.gmra.mxu1 %vm985_vm9, %v1088_v46 }
 0x33d   : > { %1841 = vmatprep.mubr.bf16.mxu1 %v3499_v61 }
 0x3e3   : > { %v1439_v23 = vpop.f32.mrf.mxu0 }
 0x3e4   : > { %v1480_v28 = vpop.f32.mrf.mxu1 }
 0x3e5   : > { %v1441_v37 = vpop.f32.mrf.mxu0 }
 0x3e6   : > { %v1482_v12 = vpop.f32.mrf.mxu1 }
 0x3e7   : > { %v1443_v22 = vpop.f32.mrf.mxu0 }
 0x3e8   : > { %v1484_v16 = vpop.f32.mrf.mxu1 }
 0x3e9   : > { %v1444_v10 = vpop.f32.mrf.mxu0 }
 0x3ea   : > { %v1485_v63 = vpop.f32.mrf.mxu1 }
 0x3f7   : > { %v1536_v11 = vpop.f32.mrf.mxu0 }
 0x3f8   : > { %v1537_v35 = vadd.f32 %v1536_v11, %v1439_v23 }
 0x3f9   : > { %v1538_v26 = vpop.f32.mrf.mxu0 }
 0x3fa   : > { %v1590_v1 = vadd.f32 %v1588_v53, %v1537_v35  ;;  %v1539_v21 = vadd.f32 %v1538_v26, %v1441_v37 }
 0x3fb   : > { %v1540_v2 = vpop.f32.mrf.mxu0 }
 0x3fc   : > { %v3159_v18 = vmax.f32 %v1590_v1, 0.0  ;;  %v1577_v14 = vpop.f32.mrf.mxu1  ;;  %v1591_v27 = vadd.f32 %v1588_v53, %v1539_v21  ;;  %v2061_v1 = vld [vmem:[%s3394_s3 + $0x28] ss:$0 sm:$0xff] }
 0x3fd   : > { %v1578_v58 = vadd.f32 %v1577_v14, %v1480_v28  ;;  %v1541_v3 = vpop.f32.mrf.mxu0 }
 0x3fe   : > { %1711 = vrot.lane.b32.xlu1 %v3159_v18, %s2073_s20  ;;  %v1579_v61 = vpop.f32.mrf.mxu1  ;;  %v3185_v52 = vmax.f32 %v1591_v27, 0.0  ;;  %v2063_v27 = vld [vmem:[%s3394_s3 + $0x38] ss:$0 sm:$0xff] }
 0x3ff   : > { %v1592_v47 = vadd.f32 %v1588_v53, %v1578_v58  ;;  %v1580_v36 = vadd.f32 %v1579_v61, %v1482_v12 }
 0x400   : > { %v1581_v44 = vpop.f32.mrf.mxu1 }
 0x401   : > { %v3163_v45 = vmax.f32 %v1592_v47, 0.0  ;;  %v1593_v38 = vadd.f32 %v1588_v53, %v1580_v36  ;;  %v2060_v53 = vld [vmem:[%s3394_s3 + $0x20] ss:$0 sm:$0xff] }
 0x402   : > { %v1582_v60 = vpop.f32.mrf.mxu1 }
 0x403   : > { %1683 = vrot.lane.b32.xlu0 %v3163_v45, %s2074_s21  ;;  %1715 = vrot.lane.b32.xlu1 %v3163_v45, %s2073_s20  ;;  %v3191_v50 = vmax.f32 %v1593_v38, 0.0  ;;  %v2062_v60 = vld [vmem:[%s3394_s3 + $0x30] ss:$0 sm:$0xff] }
 0x407   : > { %1699 = vrot.lane.b32.xlu0 %v3163_v45, %s2075_s22  ;;  %1679 = vrot.lane.b32.xlu1 %v3159_v18, %s2074_s21 }
 0x40b   : > { %1695 = vrot.lane.b32.xlu0 %v3159_v18, %s2075_s22  ;;  %1663 = vrot.lane.b32.xlu1 %v3159_v18, %s2076_s23 }
 0x40f   : > { %1667 = vrot.lane.b32.xlu0 %v3163_v45, %s2076_s23  ;;  %1631 = vrot.lane.b32.xlu1 %v3159_v18, %s2077_s24 }
 0x413   : > { %1651 = vrot.lane.b32.xlu0 %v3163_v45, %s2078_s25  ;;  %1647 = vrot.lane.b32.xlu1 %v3159_v18, %s2078_s25 }
 0x417   : > { %1713 = vrot.lane.b32.xlu0 %v3185_v52, %s2073_s20  ;;  %1635 = vrot.lane.b32.xlu1 %v3163_v45, %s2077_s24 }
 0x41b   : > { %1717 = vrot.lane.b32.xlu0 %v3191_v50, %s2073_s20  ;;  %1599 = vrot.lane.b32.xlu1 %v3159_v18, %s2079_s26 }
 0x41f   : > { %1701 = vrot.lane.b32.xlu0 %v3191_v50, %s2075_s22  ;;  %1615 = vrot.lane.b32.xlu1 %v3159_v18, %s2080_s27 }
 0x423   : > { %1669 = vrot.lane.b32.xlu0 %v3191_v50, %s2076_s23  ;;  %1681 = vrot.lane.b32.xlu1 %v3185_v52, %s2074_s21 }
 0x427   : > { %1633 = vrot.lane.b32.xlu0 %v3185_v52, %s2077_s24  ;;  %1697 = vrot.lane.b32.xlu1 %v3185_v52, %s2075_s22 }
 0x42b   : > { %1649 = vrot.lane.b32.xlu0 %v3185_v52, %s2078_s25  ;;  %1685 = vrot.lane.b32.xlu1 %v3191_v50, %s2074_s21 }
 0x42f   : > { %1653 = vrot.lane.b32.xlu0 %v3191_v50, %s2078_s25  ;;  %1665 = vrot.lane.b32.xlu1 %v3185_v52, %s2076_s23 }
 0x433   : > { %1601 = vrot.lane.b32.xlu0 %v3185_v52, %s2079_s26  ;;  %1637 = vrot.lane.b32.xlu1 %v3191_v50, %s2077_s24 }
 0x437   : > { %1617 = vrot.lane.b32.xlu0 %v3185_v52, %s2080_s27  ;;  %1605 = vrot.lane.b32.xlu1 %v3191_v50, %s2079_s26 }
 0x43b   : > { %1621 = vrot.lane.b32.xlu0 %v3191_v50, %s2080_s27  ;;  %1603 = vrot.lane.b32.xlu1 %v3163_v45, %s2079_s26 }
 0x43f   : > { %1619 = vrot.lane.b32.xlu0 %v3163_v45, %s2080_s27  ;;  %1750 = vperm.xlu1 %2008, %v1747_v13  }
 0x470   : > { %v1712_v55 = vpop.permute.xlu1 %1711 }
 0x475   : > { %v1684_v19 = vpop.permute.xlu0 %1683  ;;  %v1716_v46 = vpop.permute.xlu1 %1715 }
 0x479   : > { %v1700_v42 = vpop.permute.xlu0 %1699  ;;  %v1680_v30 = vpop.permute.xlu1 %1679 }
 0x47d   : > { %v1696_v23 = vpop.permute.xlu0 %1695  ;;  %v3234_v28 = vpop.permute.xlu1 %1663 }
 0x481   : > { %v3236_v37 = vpop.permute.xlu0 %1667  ;;  %v3238_v12 = vpop.permute.xlu1 %1631 }
 0x485   : > { %v3240_v22 = vpop.permute.xlu0 %1651  ;;  %v3242_v16 = vpop.permute.xlu1 %1647 }
 0x489   : > { %v1714_v10 = vpop.permute.xlu0 %1713  ;;  %v3244_v63 = vpop.permute.xlu1 %1635 }
 0x48a   : > { %v1720_v11 = vsel %vm934_vm0, %v1714_v10, %v1716_v46  ;;  %v1721_v35 = vsel %vm934_vm0, %v1712_v55, %v1714_v10 }
 0x48b   : > { %v1723_v26 = vmul.f32 %v2060_v53, %v1721_v35  ;;  %v1724_v2 = vmul.f32 %v2061_v1, %v1720_v11 }
 0x48d   : > { %v1743_v14 = vpack.c.bf16 %v1723_v26, %v1723_v26  ;;  %v1744_v58 = vpack.c.bf16 %v1724_v2, %v1724_v2  ;;  %v1718_v3 = vpop.permute.xlu0 %1717  ;;  %v3256_v61 = vpop.permute.xlu1 %1599 }
 0x48e   : > { %v1719_v47 = vsel %vm934_vm0, %v1716_v46, %v1718_v3  ;;  %v1722_v44 = vsel %vm934_vm0, %v1718_v3, %v1712_v55 }
 0x48f   : > { %v1725_v21 = vmul.f32 %v2062_v60, %v1719_v47  ;;  %v1726_v36 = vmul.f32 %v2063_v27, %v1722_v44  ;;  %1984 = vmatprep.subr.msk.bf16.mxu0 %vm989_vm1, %v1744_v58  ;;  %v1757_v38 = vsel %vm989_vm1, %v1743_v14, 0 }
 0x490   : > { %1775 = vmatpush1.bf16.msra.mxu0 %v1757_v38 }
 0x491   : > { %v1745_v13 = vpack.c.bf16 %v1725_v21, %v1725_v21  ;;  %v1746_v46 = vpack.c.bf16 %v1726_v36, %v1726_v36  ;;  %v1702_v10 = vpop.permute.xlu0 %1701  ;;  %v3270_v11 = vpop.permute.xlu1 %1615 }
 0x492   : > { %v1703_v58 = vsel %vm901_vm2, %v1700_v42, %v1702_v10  ;;  %v1706_v3 = vsel %vm901_vm2, %v1702_v10, %v1696_v23 }
 0x493   : > { %1986 = vmatprep.subr.msk.bf16.mxu1 %vm989_vm1, %v1746_v46  ;;  %v1763_v55 = vsel %vm989_vm1, %v1745_v13, 0  ;;  %v1709_v13 = vmul.f32 %v1703_v58, %v2467_v20 }
 0x494   : > { %1816 = vmatpush1.bf16.msra.mxu1 %v1763_v55 }
 0x495   : > { %v1670_v35 = vpop.permute.xlu0 %1669  ;;  %v1682_v53 = vpop.permute.xlu1 %1681 }
 0x496   : > { %v1688_v26 = vsel %vm868_vm4, %v1682_v53, %v1684_v19  ;;  %v1689_v1 = vsel %vm868_vm4, %v1680_v30, %v1682_v53  ;;  %v1674_v38 = vsel %vm835_vm3, %v1670_v35, %v3234_v28 }
 0x497   : > { %v1691_v60 = vmul.f32 %v1689_v1, %v2505_v43  ;;  %v1692_v21 = vmul.f32 %v1688_v26, %v2509_v56  ;;  %v1671_v43 = vsel %vm835_vm3, %v3236_v37, %v1670_v35 }
 0x498   : > { %v1677_v35 = vmul.f32 %v1671_v43, %v3475_v57 }
 0x499   : > { %v1634_v2 = vpop.permute.xlu0 %1633  ;;  %v1698_v14 = vpop.permute.xlu1 %1697 }
 0x49a   : > { %v1704_v47 = vsel %vm901_vm2, %v1698_v14, %v1700_v42  ;;  %v1705_v44 = vsel %vm901_vm2, %v1696_v23, %v1698_v14  ;;  %v1710_v23 = vmul.f32 %v1706_v3, %v2473_v25 }
 0x49b   : > { %v1707_v27 = vmul.f32 %v1705_v44, %v2519_v5  ;;  %v1708_v36 = vmul.f32 %v1704_v47, %v2521_v6  ;;  %v1678_v6 = vmul.f32 %v1674_v38, %v2491_v33  ;;  %v1737_v44 = vpack.c.bf16 %v1677_v35, %v3163_v45 }
 0x49d   : > { %v1739_v46 = vpack.c.bf16 %v1707_v27, %v1691_v60  ;;  %v1650_v10 = vpop.permute.xlu0 %1649  ;;  %v1686_v42 = vpop.permute.xlu1 %1685  ;;  %v1740_v55 = vpack.c.bf16 %v1708_v36, %v1692_v21  ;;  %v1738_v47 = vpack.c.bf16 %v1678_v6, %v3191_v50 }
 0x49e   : > { %v1687_v56 = vsel %vm868_vm4, %v1684_v19, %v1686_v42  ;;  %v1690_v5 = vsel %vm868_vm4, %v1686_v42, %v1680_v30  ;;  %v1657_v20 = vsel %vm802_vm6, %v3242_v16, %v1650_v10  ;;  %v1641_v19 = vsel %vm769_vm5, %v3238_v12, %v1634_v2 }
 0x49f   : > { %v1693_v53 = vmul.f32 %v1687_v56, %v2539_v31  ;;  %v1694_v25 = vmul.f32 %v1690_v5, %v2542_v29  ;;  %1776 = vmatprep.subr.bf16.mxu0 %v1740_v55  ;;  %v1660_v14 = vmul.f32 %v1657_v20, %v2512_v0  ;;  %v1656_v57 = vsel %vm802_vm6, %v1650_v10, %v3240_v22 }
 0x4a0   : > { %1777 = vmatpush1.bf16.msra.mxu0 %v1739_v46  ;;  %v1644_v0 = vmul.f32 %v1641_v19, %v2494_v34 }
 0x4a1   : > { %v1741_v26 = vpack.c.bf16 %v1709_v13, %v1693_v53  ;;  %v1654_v30 = vpop.permute.xlu0 %1653  ;;  %v1666_v1 = vpop.permute.xlu1 %1665  ;;  %v1742_v33 = vpack.c.bf16 %v1710_v23, %v1694_v25  ;;  %v1598_v53 = vld [vmem:[%s3400_s9] sm:$0xf] }
 0x4a2   : > { %v1672_v31 = vsel %vm835_vm3, %v1666_v1, %v3236_v37  ;;  %v1673_v29 = vsel %vm835_vm3, %v3234_v28, %v1666_v1  ;;  %v1655_v37 = vsel %vm802_vm6, %v3240_v22, %v1654_v30  ;;  %v1658_v28 = vsel %vm802_vm6, %v1654_v30, %v3242_v16 }
 0x4a3   : > { %v1675_v58 = vmul.f32 %v1673_v29, %v2548_v41  ;;  %v1676_v3 = vmul.f32 %v1672_v31, %v2560_v48  ;;  %1817 = vmatprep.subr.bf16.mxu1 %v1742_v33  ;;  %v1640_v41 = vsel %vm769_vm5, %v1634_v2, %v3244_v63  ;;  %v1661_v22 = vmul.f32 %v1656_v57, %v2515_v4 }
 0x4a4   : > { %1818 = vmatpush1.bf16.msra.mxu1 %v1741_v26  ;;  %v1732_v21 = vpack.c.bf16 %v1660_v14, %v1644_v0  ;;  %v1659_v2 = vmul.f32 %v1658_v28, %v2524_v7  ;;  %v1645_v4 = vmul.f32 %v1640_v41, %v2498_v39 }
 0x4a5   : > { %v1735_v48 = vpack.c.bf16 %v1675_v58, %v3159_v18  ;;  %v1602_v50 = vpop.permute.xlu0 %1601  ;;  %1819 = vmatprep.subr.bf16.mxu1 %v1738_v47  ;;  %v1638_v34 = vpop.permute.xlu1 %1637  ;;  %v1736_v60 = vpack.c.bf16 %v1676_v3, %v3185_v52  ;;  %v1662_v18 = vmul.f32 %v1655_v37, %v2527_v8 }
 0x4a6   : > { %v1639_v16 = vsel %vm769_vm5, %v3244_v63, %v1638_v34  ;;  %v1642_v45 = vsel %vm769_vm5, %v1638_v34, %v3238_v12  ;;  %v1609_v52 = vsel %vm703_vm7, %v3256_v61, %v1602_v50  ;;  %v1733_v13 = vpack.c.bf16 %v1661_v22, %v1645_v4 }
 0x4a7   : > { %v1643_v27 = vmul.f32 %v1642_v45, %v2583_v54  ;;  %v1646_v36 = vmul.f32 %v1639_v16, %v2606_v51  ;;  %1778 = vmatprep.subr.bf16.mxu0 %v1736_v60  ;;  %v1612_v54 = vmul.f32 %v1609_v52, %v2545_v32 }
 0x4a8   : > { %1779 = vmatpush1.bf16.msra.mxu0 %v1735_v48  ;;  %1820 = vmatpush1.bf16.msra.mxu1 %v1737_v44 }
 0x4a9   : > { %v1731_v63 = vpack.c.bf16 %v1659_v2, %v1643_v27  ;;  %v1618_v12 = vpop.permute.xlu0 %1617  ;;  %1780 = vmatprep.subr.bf16.mxu0 %v1732_v21  ;;  %v1606_v38 = vpop.permute.xlu1 %1605  ;;  %v1734_v7 = vpack.c.bf16 %v1662_v18, %v1646_v36 }
 0x4aa   : > { %v1625_v8 = vsel %vm736_vm8, %v3270_v11, %v1618_v12  ;;  %v1610_v51 = vsel %vm703_vm7, %v1606_v38, %v3256_v61 }
 0x4ab   : > { %v1628_v39 = vmul.f32 %v1625_v8, %v2576_v15  ;;  %1821 = vmatprep.subr.bf16.mxu1 %v1734_v7  ;;  %v1611_v23 = vmul.f32 %v1610_v51, %v3480_v9 }
 0x4ac   : > { %1781 = vmatpush1.bf16.msra.mxu0 %v1731_v63  ;;  %1822 = vmatpush1.bf16.msra.mxu1 %v1733_v13 }
 0x4ad   : > { %v1622_v46 = vpop.permute.xlu0 %1621  ;;  %v1604_v10 = vpop.permute.xlu1 %1603  ;;  %v1728_v42 = vpack.c.bf16 %v1628_v39, %v1612_v54 }
 0x4ae   : > { %v1626_v55 = vsel %vm736_vm8, %v1622_v46, %v3270_v11  ;;  %v1607_v15 = vsel %vm703_vm7, %v1604_v10, %v1606_v38  ;;  %v1608_v61 = vsel %vm703_vm7, %v1602_v50, %v1604_v10 }
 0x4af   : > { %v1627_v32 = vmul.f32 %v1626_v55, %v3482_v24  ;;  %1782 = vmatprep.subr.bf16.mxu0 %v1728_v42  ;;  %v1613_v11 = vmul.f32 %v1608_v61, %v3484_v40  ;;  %v1614_v9 = vmul.f32 %v1607_v15, %v3481_v17 }
 0x4b1   : > { %v1727_v43 = vpack.c.bf16 %v1627_v32, %v1611_v23  ;;  %v1620_v56 = vpop.permute.xlu0 %1619 }
 0x4b2   : > { %v1623_v5 = vsel %vm736_vm8, %v1620_v56, %v1622_v46  ;;  %v1624_v6 = vsel %vm736_vm8, %v1618_v12, %v1620_v56 }
 0x4b3   : > { %v1629_v24 = vmul.f32 %v1624_v6, %v3479_v62  ;;  %v1630_v20 = vmul.f32 %v1623_v5, %v3483_v49  ;;  %1783 = vmatpush1.bf16.msra.mxu0 %v1727_v43 }
 0x4b5   : > { %v1729_v25 = vpack.c.bf16 %v1629_v24, %v1613_v11  ;;  %v1730_v35 = vpack.c.bf16 %v1630_v20, %v1614_v9 }
 0x4b6   : > { %1985 = vmatmul.mubr.msk.bf16.vlgmr.msra.gmra.mxu0 %vm985_vm9, %v1598_v53 }
 0x4b7   : > { %1823 = vmatprep.subr.bf16.mxu1 %v1730_v35 }
 0x4b8   : > { %1824 = vmatpush1.bf16.msra.mxu1 %v1729_v25 }
 0x4ba   : > { %v1751_v59 = vpop.permute.xlu1 %1750 }
 0x4bb   : > { %1987 = vmatmul.mubr.msk.bf16.vlgmr.msra.gmra.mxu1 %vm985_vm9, %v1598_v53 }
 0x576   : > { %v1802_v40 = vpop.f32.mrf.mxu0 }
 0x577   : > { %v1803_v17 = vadd.f32 %v1802_v40, %v1751_v59 }
 0x578   : > { %v1804_v19 = vpop.f32.mrf.mxu0 }
 0x579   : > { %v1805_v62 = vadd.f32 %v1804_v19, %v1751_v59  ;;  %v1850_v49 = vmax.f32 %v1803_v17, 0.0 }
 0x57a   : > { %v1806_v26 = vpop.f32.mrf.mxu0 }
 0x57b   : > { %v1851_v30 = vmax.f32 %v1805_v62, 0.0  ;;  %1854 = vst [vmem:[%s405_s18] sm:$0xff] %v1850_v49  ;;  %v1843_v1 = vpop.f32.mrf.mxu1 }
 0x57c   : > { %v1844_v33 = vadd.f32 %v1843_v1, %v1751_v59  ;;  %v1807_v14 = vpop.f32.mrf.mxu0 }
 0x57d   : > { %1855 = vst [vmem:[%s405_s18 + $0x8] sm:$0xff] %v1851_v30  ;;  %v1845_v31 = vpop.f32.mrf.mxu1 }
 0x57e   : > { %v1852_v29 = vmax.f32 %v1844_v33, 0.0  ;;  %v1846_v57 = vadd.f32 %v1845_v31, %v1751_v59 }
 0x57f   : > { %v1847_v58 = vpop.f32.mrf.mxu1 }
 0x580   : > { %1856 = vst [vmem:[%s405_s18 + $0x10] sm:$0xff] %v1852_v29  ;;  %v1853_v3 = vmax.f32 %v1846_v57, 0.0 }
 0x581   : > { %v1848_v47 = vpop.f32.mrf.mxu1 }
 0x582   : > { %1857 = vst [vmem:[%s405_s18 + $0x18] sm:$0xff] %v1853_v3 }
 0x583 PF: > { %s21_s17 = sadd.s32 1, %s2070_s17  }
 0x584   : > { %p18_p5 = scmp.ge.s32.totalorder %s21_s17, 4  }
 0x586   :  { %20 = sbr.rel (!%p18_p5) target bundleno = 1 (0x1), region = 97 }

</bundles_post_ra>
